<compile_context>
chip_gen: v5e
topology: v5e:2x2
jax: 0.10.0
libtpu: 0.0.40
codegen_flags: <defaults>
</compile_context>

<pallas_src>
import functools

import jax
import jax.numpy as jnp
from jax.experimental import pallas as pl
from jax.experimental.pallas import tpu as pltpu

EPS = 1e-5      # nn.InstanceNorm2d default
KSIZE = 3       # SameBlock2d default kernel_size (padding=1)


# ---------------------------------------------------------------------------
# Fused kernel: im2col 3x3 conv (single MXU dot) + instance-norm + ADAIN + ReLU
# ---------------------------------------------------------------------------
def _sameblock_kernel(xp_ref, wt_ref, gamma_ref, beta_ref, o_ref, *,
                      H, W, store_hw_last):
    # xp_ref    : (1, H+2, W+2, Cin)  zero-padded NHWC input, one sample
    # wt_ref    : (9*Cin, TC)         im2col conv weight, one Cout tile
    # gamma_ref : (1, 1, TC)          ADAIN gamma for this (sample, Cout tile)
    # beta_ref  : (1, 1, TC)          ADAIN beta
    # o_ref     : (1, TC, H*W) if store_hw_last else (1, H*W, TC)
    HW = H * W
    cin = xp_ref.shape[3]

    # ---- im2col: 9 shifted patches concatenated along the contraction axis ----
    # Contraction index = tap*Cin + c, matching wt built as (9, Cin, Cout)->(9*Cin, Cout).
    taps = [xp_ref[0, dy:dy + H, dx:dx + W, :].reshape(HW, cin)
            for dy in range(KSIZE) for dx in range(KSIZE)]
    patches = jnp.concatenate(taps, axis=1)                     # (HW, 9*Cin)

    # ---- single MXU matmul; conv bias omitted (cancels under instance norm) ----
    acc = jnp.dot(patches, wt_ref[...],
                  preferred_element_type=jnp.float32)           # (HW, TC) f32

    # ---- one-pass instance-norm statistics (per channel, over HW) ----
    mu = jnp.mean(acc, axis=0, keepdims=True)                   # (1, TC)
    m2 = jnp.mean(acc * acc, axis=0, keepdims=True)             # (1, TC)
    var = jnp.maximum(m2 - mu * mu, 0.0)                        # guard f32 cancellation

    # ---- fold IN + (1+gamma)/beta into per-channel scale/shift; modulate + ReLU ----
    gamma = gamma_ref[0]                                        # (1, TC)
    beta = beta_ref[0]                                          # (1, TC)
    s = jax.lax.rsqrt(var + EPS) * (1.0 + gamma)
    t = beta - mu * s
    out = jnp.maximum(acc * s + t, 0.0)                         # (HW, TC)

    if store_hw_last:
        o_ref[0] = out.T.astype(o_ref.dtype)                    # (TC, HW), HW lane-dense
    else:
        o_ref[0] = out.astype(o_ref.dtype)                      # (HW, TC), TC lane-dense


def sameblock2d_forward(params, x, feature):
    """x: (N, Cin, H, W) f32 ; feature: (N, feature_nc) f32 -> (N, Cout, H, W)."""
    n, cin, h, w = x.shape
    cout = params["conv_w"].shape[0]
    hw = h * w
    hp = jax.lax.Precision.HIGHEST

    # ---- XLA-side layout plumbing ------------------------------------------
    # NCHW -> zero-padded NHWC so every 3x3 tap is a contiguous (H, W, Cin) slice.
    xp = jnp.transpose(x, (0, 2, 3, 1))
    xp = jnp.pad(xp, ((0, 0), (1, 1), (1, 1), (0, 0)))

    # Conv weight (Cout, Cin, 3, 3) -> im2col (9*Cin, Cout), tap-major rows.
    wt = jnp.transpose(params["conv_w"], (2, 3, 1, 0)).reshape(KSIZE * KSIZE * cin, cout)

    # gamma/beta MLP batched in XLA (in-kernel it is an M=1 matmul wasting the MXU).
    f = feature.reshape(n, -1)
    actv = jnp.maximum(jnp.dot(f, params["w1"], precision=hp) + params["b1"], 0.0)
    gamma = (jnp.dot(actv, params["wg"], precision=hp) + params["bg"]).reshape(n, 1, cout)
    beta = (jnp.dot(actv, params["wb"], precision=hp) + params["bb"]).reshape(n, 1, cout)

    # ---- tiling --------------------------------------------------------------
    # Cout tile matched to the MXU width; per-channel IN stats make tiles independent.
    if cout % 256 == 0:
        tc = 256
    elif cout % 128 == 0:
        tc = 128
    else:
        tc = cout
    n_ct = cout // tc
    # Small-Cout configs keep HW on the lane axis; at tc >= 128 the natural (HW, TC)
    # layout is already lane-dense and the in-kernel transpose is skipped entirely.
    store_hw_last = tc < 128

    kern = functools.partial(_sameblock_kernel, H=h, W=w, store_hw_last=store_hw_last)

    # Scheduler hints + explicit VMEM budget.
    flops = 2 * n * hw * KSIZE * KSIZE * cin * cout + 8 * n * cout * hw
    bytes_accessed = 4 * (n * (h + 2) * (w + 2) * cin + KSIZE * KSIZE * cin * cout
                          + 2 * n * cout + n * cout * hw)
    per_step_bytes = 4 * ((h + 2) * (w + 2) * cin            # padded input block
                          + KSIZE * KSIZE * cin * tc         # weight tile
                          + 2 * tc                           # gamma / beta
                          + hw * tc                          # output block
                          + hw * KSIZE * KSIZE * cin         # im2col patches
                          + hw * tc)                         # live f32 accumulator
    vmem_limit = int(min(64 * 1024 * 1024, max(32 * 1024 * 1024, 4 * per_step_bytes)))

    if store_hw_last:
        out_shape = jax.ShapeDtypeStruct((n, cout, hw), jnp.float32)
        out_specs = pl.BlockSpec((1, tc, hw), lambda i, j: (i, j, 0))
    else:
        out_shape = jax.ShapeDtypeStruct((n, hw, cout), jnp.float32)
        out_specs = pl.BlockSpec((1, hw, tc), lambda i, j: (i, 0, j))

    out = pl.pallas_call(
        kern,
        out_shape=out_shape,
        grid=(n, n_ct),
        in_specs=[
            # Invariant in j -> not re-fetched across consecutive Cout tiles.
            pl.BlockSpec((1, h + 2, w + 2, cin), lambda i, j: (i, 0, 0, 0)),  # x padded
            pl.BlockSpec((KSIZE * KSIZE * cin, tc), lambda i, j: (0, j)),     # conv im2col
            pl.BlockSpec((1, 1, tc), lambda i, j: (i, 0, j)),                 # gamma
            pl.BlockSpec((1, 1, tc), lambda i, j: (i, 0, j)),                 # beta
        ],
        out_specs=out_specs,
        compiler_params=pltpu.CompilerParams(
            dimension_semantics=("parallel", "parallel"),
            vmem_limit_bytes=vmem_limit),
        cost_estimate=pl.CostEstimate(
            flops=flops, transcendentals=n * cout, bytes_accessed=bytes_accessed),
    )(xp, wt, gamma, beta)

    if store_hw_last:
        return out.reshape(n, cout, h, w)
    return jnp.transpose(out, (0, 2, 1)).reshape(n, cout, h, w)


# ---------------------------------------------------------------------------
# Parameter init (mimics nn.Conv2d / nn.Linear default U(-1/sqrt(fan_in), ...))
# Linear weights are stored (in, out) so the wrapper uses plain jnp.dot.
# ---------------------------------------------------------------------------
def init_sameblock_params(key, in_features, out_features, feature_nc, nhidden=128):
    ks = jax.random.split(key, 8)

    def lin(kw, kb, fan_in, shape_w, shape_b):
        bound = 1.0 / jnp.sqrt(fan_in)
        w = jax.random.uniform(kw, shape_w, jnp.float32, -bound, bound)
        b = jax.random.uniform(kb, shape_b, jnp.float32, -bound, bound)
        return w, b

    conv_w, conv_b = lin(ks[0], ks[1], in_features * KSIZE * KSIZE,
                         (out_features, in_features, KSIZE, KSIZE), (out_features,))
    w1, b1 = lin(ks[2], ks[3], feature_nc, (feature_nc, nhidden), (1, nhidden))
    wg, bg = lin(ks[4], ks[5], nhidden, (nhidden, out_features), (1, out_features))
    wb, bb = lin(ks[6], ks[7], nhidden, (nhidden, out_features), (1, out_features))
    return {"conv_w": conv_w, "conv_b": conv_b, "w1": w1, "b1": b1,
            "wg": wg, "bg": bg, "wb": wb, "bb": bb}


# ---------------------------------------------------------------------------
# Pure-JAX reference (conv+bias -> ADAIN -> ReLU) for the in-script sanity check
# ---------------------------------------------------------------------------
def sameblock2d_reference(params, x, feature):
    n = x.shape[0]
    hp = jax.lax.Precision.HIGHEST
    conv = jax.lax.conv_general_dilated(
        x, params["conv_w"], window_strides=(1, 1),
        padding=((1, 1), (1, 1)),
        dimension_numbers=("NCHW", "OIHW", "NCHW"), precision=hp)
    conv = conv + params["conv_b"].reshape(1, -1, 1, 1)

    f = feature.reshape(n, -1)
    actv = jnp.maximum(jnp.dot(f, params["w1"], precision=hp) + params["b1"], 0.0)
    gamma = jnp.dot(actv, params["wg"], precision=hp) + params["bg"]
    beta = jnp.dot(actv, params["wb"], precision=hp) + params["bb"]

    mu = conv.mean(axis=(2, 3), keepdims=True)
    var = ((conv - mu) ** 2).mean(axis=(2, 3), keepdims=True)
    x_hat = (conv - mu) / jnp.sqrt(var + EPS)
    out = x_hat * (1.0 + gamma[:, :, None, None]) + beta[:, :, None, None]
    return jnp.maximum(out, 0.0)


if __name__ == "__main__":
    N, CIN, COUT, H, W = 2, 4, 4, 16, 16     # out_features = norm_nc = 4
    FEATURE_NC = 32                          # AdaINc

    key = jax.random.PRNGKey(0)
    k_p, k_x, k_f = jax.random.split(key, 3)

    params = init_sameblock_params(k_p, CIN, COUT, FEATURE_NC)
    x = jax.random.normal(k_x, (N, CIN, H, W), dtype=jnp.float32)
    feature = jax.random.normal(k_f, (N, FEATURE_NC), dtype=jnp.float32)

    out = jax.block_until_ready(sameblock2d_forward(params, x, feature))

    ref = sameblock2d_reference(params, x, feature)
    assert out.shape == (N, COUT, H, W)
    assert jnp.allclose(out, ref, rtol=1e-4, atol=1e-4), "mismatch vs reference"

    print("KERNEL_OK")
</pallas_src>

<mosaic_0001>
module attributes {stable_mosaic.version = 11 : i64} {
  func.func @_sameblock_kernel(%arg0: i32, %arg1: i32, %arg2: memref<1x18x18x4xf32, #tpu.memory_space<vmem>>, %arg3: memref<36x4xf32, #tpu.memory_space<vmem>>, %arg4: memref<1x1x4xf32, #tpu.memory_space<vmem>>, %arg5: memref<1x1x4xf32, #tpu.memory_space<vmem>>, %arg6: memref<1x4x256xf32, #tpu.memory_space<vmem>>) attributes {dimension_semantics = [#tpu.dimension_semantics<parallel>, #tpu.dimension_semantics<parallel>], iteration_bounds = array<i64: 2, 1>, scalar_prefetch = 0 : i64, scratch_operands = 0 : i64, tpu.core_type = #tpu.core_type<tc>, window_params = [{transform_indices = @transform_0, window_bounds = array<i64: 1, 18, 18, 4>}, {transform_indices = @transform_1, window_bounds = array<i64: 36, 4>}, {transform_indices = @transform_2, window_bounds = array<i64: 1, 1, 4>}, {transform_indices = @transform_3, window_bounds = array<i64: 1, 1, 4>}, {transform_indices = @transform_4, window_bounds = array<i64: 1, 4, 256>}]} {
    %c0 = arith.constant 0 : index
    %c0_0 = arith.constant 0 : index
    %c0_1 = arith.constant 0 : index
    %c0_2 = arith.constant 0 : index
    %0 = vector.load %arg2[%c0, %c0_0, %c0_1, %c0_2] : memref<1x18x18x4xf32, #tpu.memory_space<vmem>>, vector<1x16x16x4xf32>
    %1 = vector.shape_cast %0 : vector<1x16x16x4xf32> to vector<16x16x4xf32>
    %2 = vector.shape_cast %1 : vector<16x16x4xf32> to vector<256x4xf32>
    %c0_3 = arith.constant 0 : index
    %c0_4 = arith.constant 0 : index
    %c1 = arith.constant 1 : index
    %c0_5 = arith.constant 0 : index
    %3 = vector.load %arg2[%c0_3, %c0_4, %c1, %c0_5] : memref<1x18x18x4xf32, #tpu.memory_space<vmem>>, vector<1x16x16x4xf32>
    %4 = vector.shape_cast %3 : vector<1x16x16x4xf32> to vector<16x16x4xf32>
    %5 = vector.shape_cast %4 : vector<16x16x4xf32> to vector<256x4xf32>
    %c0_6 = arith.constant 0 : index
    %c0_7 = arith.constant 0 : index
    %c2 = arith.constant 2 : index
    %c0_8 = arith.constant 0 : index
    %6 = vector.load %arg2[%c0_6, %c0_7, %c2, %c0_8] : memref<1x18x18x4xf32, #tpu.memory_space<vmem>>, vector<1x16x16x4xf32>
    %7 = vector.shape_cast %6 : vector<1x16x16x4xf32> to vector<16x16x4xf32>
    %8 = vector.shape_cast %7 : vector<16x16x4xf32> to vector<256x4xf32>
    %c0_9 = arith.constant 0 : index
    %c1_10 = arith.constant 1 : index
    %c0_11 = arith.constant 0 : index
    %c0_12 = arith.constant 0 : index
    %9 = vector.load %arg2[%c0_9, %c1_10, %c0_11, %c0_12] : memref<1x18x18x4xf32, #tpu.memory_space<vmem>>, vector<1x16x16x4xf32>
    %10 = vector.shape_cast %9 : vector<1x16x16x4xf32> to vector<16x16x4xf32>
    %11 = vector.shape_cast %10 : vector<16x16x4xf32> to vector<256x4xf32>
    %c0_13 = arith.constant 0 : index
    %c1_14 = arith.constant 1 : index
    %c1_15 = arith.constant 1 : index
    %c0_16 = arith.constant 0 : index
    %12 = vector.load %arg2[%c0_13, %c1_14, %c1_15, %c0_16] : memref<1x18x18x4xf32, #tpu.memory_space<vmem>>, vector<1x16x16x4xf32>
    %13 = vector.shape_cast %12 : vector<1x16x16x4xf32> to vector<16x16x4xf32>
    %14 = vector.shape_cast %13 : vector<16x16x4xf32> to vector<256x4xf32>
    %c0_17 = arith.constant 0 : index
    %c1_18 = arith.constant 1 : index
    %c2_19 = arith.constant 2 : index
    %c0_20 = arith.constant 0 : index
    %15 = vector.load %arg2[%c0_17, %c1_18, %c2_19, %c0_20] : memref<1x18x18x4xf32, #tpu.memory_space<vmem>>, vector<1x16x16x4xf32>
    %16 = vector.shape_cast %15 : vector<1x16x16x4xf32> to vector<16x16x4xf32>
    %17 = vector.shape_cast %16 : vector<16x16x4xf32> to vector<256x4xf32>
    %c0_21 = arith.constant 0 : index
    %c2_22 = arith.constant 2 : index
    %c0_23 = arith.constant 0 : index
    %c0_24 = arith.constant 0 : index
    %18 = vector.load %arg2[%c0_21, %c2_22, %c0_23, %c0_24] : memref<1x18x18x4xf32, #tpu.memory_space<vmem>>, vector<1x16x16x4xf32>
    %19 = vector.shape_cast %18 : vector<1x16x16x4xf32> to vector<16x16x4xf32>
    %20 = vector.shape_cast %19 : vector<16x16x4xf32> to vector<256x4xf32>
    %c0_25 = arith.constant 0 : index
    %c2_26 = arith.constant 2 : index
    %c1_27 = arith.constant 1 : index
    %c0_28 = arith.constant 0 : index
    %21 = vector.load %arg2[%c0_25, %c2_26, %c1_27, %c0_28] : memref<1x18x18x4xf32, #tpu.memory_space<vmem>>, vector<1x16x16x4xf32>
    %22 = vector.shape_cast %21 : vector<1x16x16x4xf32> to vector<16x16x4xf32>
    %23 = vector.shape_cast %22 : vector<16x16x4xf32> to vector<256x4xf32>
    %c0_29 = arith.constant 0 : index
    %c2_30 = arith.constant 2 : index
    %c2_31 = arith.constant 2 : index
    %c0_32 = arith.constant 0 : index
    %24 = vector.load %arg2[%c0_29, %c2_30, %c2_31, %c0_32] : memref<1x18x18x4xf32, #tpu.memory_space<vmem>>, vector<1x16x16x4xf32>
    %25 = vector.shape_cast %24 : vector<1x16x16x4xf32> to vector<16x16x4xf32>
    %26 = vector.shape_cast %25 : vector<16x16x4xf32> to vector<256x4xf32>
    %27 = tpu.concatenate %2, %5, %8, %11, %14, %17, %20, %23, %26 in 1 : vector<256x4xf32>, vector<256x4xf32>, vector<256x4xf32>, vector<256x4xf32>, vector<256x4xf32>, vector<256x4xf32>, vector<256x4xf32>, vector<256x4xf32>, vector<256x4xf32> -> vector<256x36xf32>
    %c0_33 = arith.constant 0 : index
    %c0_34 = arith.constant 0 : index
    %28 = vector.load %arg3[%c0_33, %c0_34] : memref<36x4xf32, #tpu.memory_space<vmem>>, vector<36x4xf32>
    %cst = arith.constant dense<0.000000e+00> : vector<256x4xf32>
    %29 = tpu.matmul %27, %28, %cst {dimension_numbers = #tpu.dot_dimension_numbers<[1], [0], [0], [1], [0, 0, 1, 1], [], []>} : vector<256x36xf32>, vector<36x4xf32>, vector<256x4xf32> -> vector<256x4xf32>
    %cst_35 = arith.constant dense<0.000000e+00> : vector<4xf32>
    %30 = vector.multi_reduction <add>, %29, %cst_35 [0] : vector<256x4xf32> to vector<4xf32>
    %31 = vector.shape_cast %30 : vector<4xf32> to vector<1x4xf32>
    %cst_36 = arith.constant 2.560000e+02 : f32
    %32 = vector.broadcast %cst_36 : f32 to vector<1x4xf32>
    %33 = arith.divf %31, %32 : vector<1x4xf32>
    %34 = arith.mulf %29, %29 : vector<256x4xf32>
    %cst_37 = arith.constant dense<0.000000e+00> : vector<4xf32>
    %35 = vector.multi_reduction <add>, %34, %cst_37 [0] : vector<256x4xf32> to vector<4xf32>
    %36 = vector.shape_cast %35 : vector<4xf32> to vector<1x4xf32>
    %cst_38 = arith.constant 2.560000e+02 : f32
    %37 = vector.broadcast %cst_38 : f32 to vector<1x4xf32>
    %38 = arith.divf %36, %37 : vector<1x4xf32>
    %39 = arith.mulf %33, %33 : vector<1x4xf32>
    %40 = arith.subf %38, %39 : vector<1x4xf32>
    %cst_39 = arith.constant 0.000000e+00 : f32
    %41 = vector.broadcast %cst_39 : f32 to vector<1x4xf32>
    %42 = arith.maximumf %40, %41 : vector<1x4xf32>
    %c0_40 = arith.constant 0 : index
    %c0_41 = arith.constant 0 : index
    %c0_42 = arith.constant 0 : index
    %43 = vector.load %arg4[%c0_40, %c0_41, %c0_42] : memref<1x1x4xf32, #tpu.memory_space<vmem>>, vector<1x1x4xf32>
    %44 = vector.shape_cast %43 : vector<1x1x4xf32> to vector<1x4xf32>
    %c0_43 = arith.constant 0 : index
    %c0_44 = arith.constant 0 : index
    %c0_45 = arith.constant 0 : index
    %45 = vector.load %arg5[%c0_43, %c0_44, %c0_45] : memref<1x1x4xf32, #tpu.memory_space<vmem>>, vector<1x1x4xf32>
    %46 = vector.shape_cast %45 : vector<1x1x4xf32> to vector<1x4xf32>
    %cst_46 = arith.constant 9.99999974E-6 : f32
    %47 = vector.broadcast %cst_46 : f32 to vector<1x4xf32>
    %48 = arith.addf %42, %47 : vector<1x4xf32>
    %49 = math.rsqrt %48 : vector<1x4xf32>
    %cst_47 = arith.constant 1.000000e+00 : f32
    %50 = vector.broadcast %cst_47 : f32 to vector<1x4xf32>
    %51 = arith.addf %50, %44 : vector<1x4xf32>
    %52 = arith.mulf %49, %51 : vector<1x4xf32>
    %53 = arith.mulf %33, %52 : vector<1x4xf32>
    %54 = arith.subf %46, %53 : vector<1x4xf32>
    %55 = vector.broadcast %52 : vector<1x4xf32> to vector<256x4xf32>
    %56 = arith.mulf %29, %55 : vector<256x4xf32>
    %57 = vector.broadcast %54 : vector<1x4xf32> to vector<256x4xf32>
    %58 = arith.addf %56, %57 : vector<256x4xf32>
    %cst_48 = arith.constant 0.000000e+00 : f32
    %59 = vector.broadcast %cst_48 : f32 to vector<256x4xf32>
    %60 = arith.maximumf %58, %59 : vector<256x4xf32>
    %61 = tpu.transpose %60, [1, 0] : vector<256x4xf32> -> vector<4x256xf32>
    %c0_49 = arith.constant 0 : index
    %c0_50 = arith.constant 0 : index
    %c0_51 = arith.constant 0 : index
    %62 = vector.load %arg6[%c0_49, %c0_50, %c0_51] : memref<1x4x256xf32, #tpu.memory_space<vmem>>, vector<1x4x256xf32>
    %63 = vector.shape_cast %62 : vector<1x4x256xf32> to vector<4x256xf32>
    %64 = vector.shape_cast %61 : vector<4x256xf32> to vector<1x4x256xf32>
    tpu.vector_store %arg6[%c0_49, %c0_50, %c0_51], %64 {strides = array<i32>} : memref<1x4x256xf32, #tpu.memory_space<vmem>>, vector<1x4x256xf32>,
    return
  }
  func.func @transform_0(%arg0: i32, %arg1: i32) -> (i32, i32, i32, i32) {
    %c0_i32 = arith.constant 0 : i32
    %c0_i32_0 = arith.constant 0 : i32
    %c0_i32_1 = arith.constant 0 : i32
    %c0_i32_2 = arith.constant 0 : i32
    return %arg0, %c0_i32, %c0_i32_0, %c0_i32_1 : i32, i32, i32, i32
  }
  func.func @transform_1(%arg0: i32, %arg1: i32) -> (i32, i32) {
    %c0_i32 = arith.constant 0 : i32
    %c0_i32_0 = arith.constant 0 : i32
    return %c0_i32, %arg1 : i32, i32
  }
  func.func @transform_2(%arg0: i32, %arg1: i32) -> (i32, i32, i32) {
    %c0_i32 = arith.constant 0 : i32
    %c0_i32_0 = arith.constant 0 : i32
    return %arg0, %c0_i32, %arg1 : i32, i32, i32
  }
  func.func @transform_3(%arg0: i32, %arg1: i32) -> (i32, i32, i32) {
    %c0_i32 = arith.constant 0 : i32
    %c0_i32_0 = arith.constant 0 : i32
    return %arg0, %c0_i32, %arg1 : i32, i32, i32
  }
  func.func @transform_4(%arg0: i32, %arg1: i32) -> (i32, i32, i32) {
    %c0_i32 = arith.constant 0 : i32
    %c0_i32_0 = arith.constant 0 : i32
    return %arg0, %arg1, %c0_i32 : i32, i32, i32
  }
}

</mosaic_0001>

<bundles_post_ra>
// kernel: tpu_custom_call.1
= control target key start
LH: loop header
LB: loop body
LE: loop exit
PB: predicated region body
PF: predicated region fallthrough
CT: control target
= control target key end

     0   :  { %9 = vsyncpa [#allocation3], 0  ;;  %s5122_s0 = inlined_call_operand.vmem [shape: f32[2,18,18,4], index: 0, kind: input, shape index: {}]   ;;  %s5123_s1 = inlined_call_operand.vmem [shape: f32[36,4], index: 1, kind: input, shape index: {}]   ;;  %s5124_s2 = inlined_call_operand.vmem [shape: f32[2,1,4], index: 2, kind: input, shape index: {}]   ;;  %s5125_s3 = inlined_call_operand.vmem [shape: f32[2,1,4], index: 3, kind: input, shape index: {}]   ;;  %s5126_s4 = inlined_call_operand.hbm [shape: f32[2,4,256], index: 4, kind: output, shape index: {}]  }
   0x1   :  { %11 = vsyncpa [#allocation3 + $0x1], 0  ;;  %s3017_s15 = smov 0   ;;  %s3019_s16 = smov 0  }
   0x2   :  { %s3021_s17 = smov 0   ;;  %s3023_s18 = smov 0  }
   0x3   :  { %s3025_s19 = smov 0   ;;  %s3027_s20 = smov 0  }
   0x4 LB: > { %s2571_s21 = sadd.s32 4294967295, %s2981_s20   ;;  %s2572_s22 = sadd.s32 4294967294, %s2981_s20   ;;  %s2981_s20 = sphi %s3027_s20, %s17_s20   ;;  %s2977_s19 = sphi %s3025_s19, %s5362_s19   ;;  %s2973_s18 = sphi %s3023_s18, %s5361_s18   ;;  %s2969_s17 = sphi %s3021_s17, %s5360_s17   ;;  %s2965_s16 = sphi %s3019_s16, %s5359_s16   ;;  %s2961_s15 = sphi %s3017_s15, %s5358_s15  }
   0x5   : > { %s29_s23 = sadd.s32 1, %s2977_s19  ;;  %s146_s24 = sadd.s32 1, %s2969_s17 }
   0x6   : > { %p31_p0 = scmp.ge.s32.totalorder %s29_s23, 2  ;;  %p156_p1 = scmp.ne.s32.totalorder %s2969_s17, %s2965_s16 }
   0x7   : > { %p157_p2 = scmp.eq.s32.totalorder %s2571_s21, 1  ;;  %p162_p3 = scmp.ne.s32.totalorder %s2965_s16, %s2961_s15 }
   0x8   : > { %s5364_s23 = smov (%p31_p0, %s29_s23), 0  ;;  %p163_p5 = scmp.eq.s32.totalorder %s2572_s22, 1 }
   0x9   : > { %p3057_p4 = por %p157_p2, %p156_p1  ;;  %s141_s26 = ssub.s32 %s2977_s19, %s5364_s23 }
   0xa   : > { %p2576_p6 = scmp.ge.s32.totalorder %s2981_s20, 1  ;;  %p144_p7 = scmp.eq.s32.totalorder %s141_s26, 0 }
   0xb   : > { %p3064_p8 = por %p163_p5, %p162_p3  ;;  %p214_p9 = scmp.lt.s32.totalorder %s2981_s20, 3 }
   0xc   : > { %s3070_s28 = scalar_select %p144_p7, %s2969_s17, %s146_s24  }
   0xd   : > { %p215_p10 = pnand %p2576_p6, %p214_p9 }
   0xf   : > { %218 = sbr.rel (%p215_p10) target bundleno = 1181 (0x49d), region = 36 }
  0x14   : > { %p256_p11 = scmp.lt.s32.totalorder %s2973_s18, 1  ;;  %s2983_s8 = smov 4   ;;  %vm1591_vm0 = vcmask 31744   ;;  %vm1624_vm1 = vcmask 64512   ;;  %vm1657_vm2 = vcmask 97280   ;;  %vm1690_vm3 = vcmask 130048  }
  0x15   : > { %s2984_s9 = smov 8   ;;  %s2985_s10 = smov 12   ;;  %vm1723_vm4 = vcmask 162816   ;;  %vm1957_vm5 = vcmask 1043456   ;;  %vm1756_vm6 = vcmask 195584   ;;  %vm1789_vm7 = vcmask 228352  }
  0x16   : > { %s3074_s29 = scalar_select %p256_p11, %s2973_s18, 1  ;;  %vm1822_vm8 = vcmask 261120   ;;  %vm1860_vm9 = vcmask 293888  }
  0x17   : > { %s2986_s11 = smov 16   ;;  %s2987_s12 = smov 20  }
  0x18   : > { %s2825_s30 = smul.u32 432, %s3074_s29  ;;  %s2988_s13 = smov 28  }
  0x19   : > { %s2989_s14 = smov 24   ;;  %s2990_s21 = smov 32  }
  0x1a   : > { %s3080_s7 = scalar_lea.vmem %s5122_s0, %s2825_s30  ;;  %s276_s22 = scalar_lea.vmem %s5125_s3, %s3074_s29 }
  0x1b   : > { %v3083_v0 = vld [vmem:[%s3080_s7 + $0x31] sm:$0xff]  ;;  %v3086_v1 = vld [vmem:[%s3080_s7 + $0x19] sm:$0xff]  ;;  %v309_v2 = vld [vmem:[%s3080_s7 + $0x1] sm:$0xff]  ;;  %s2809_s26 = sshll.u32 %s2973_s18, 3 }
  0x1c   : > { %607 = vrot.lane.b32.xlu2 %v3083_v0, %s2983_s8  ;;  %603 = vrot.lane.b32.xlu1 %v3086_v1, %s2983_s8  ;;  %v3095_v3 = vld [vmem:[%s3080_s7 + $0x39] sm:$0xff]  ;;  %v3098_v4 = vld [vmem:[%s3080_s7 + $0x21] sm:$0xff]  ;;  %s2457_s6 = scalar_lea.hbm %s5126_s4, %s2809_s26 }
  0x1d   : > { %599 = vrot.lane.b32.xlu0 %v309_v2, %s2983_s8  ;;  %v310_v5 = vld [vmem:[%s3080_s7 + $0x9] sm:$0xff]  ;;  %v3107_v6 = vld [vmem:[%s3080_s7 + $0x61] sm:$0xff]  ;;  %v3110_v7 = vld [vmem:[%s3080_s7 + $0x51] sm:$0xff] }
  0x1e   : > { %v3113_v8 = vld [vmem:[%s3080_s7 + $0x49] sm:$0xff]  ;;  %v3122_v9 = vld [vmem:[%s3080_s7 + $0x81] sm:$0xff]  ;;  %v3125_v10 = vld [vmem:[%s3080_s7 + $0x79] sm:$0xff] }
  0x1f   : > { %v3128_v11 = vld [vmem:[%s3080_s7 + $0x69] sm:$0xff]  ;;  %v3140_v13 = vld [vmem:[%s3080_s7 + $0x99] sm:$0xff]  ;;  %v3143_v14 = vld [vmem:[%s3080_s7 + $0x91] sm:$0xff] }
  0x20   : > { %v3137_v12 = vld [vmem:[%s3080_s7 + $0xa9] sm:$0xff]  ;;  %v3155_v16 = vld [vmem:[%s3080_s7 + $0xc1] sm:$0xff]  ;;  %v3158_v17 = vld [vmem:[%s3080_s7 + $0xb1] sm:$0xff] }
  0x21   : > { %v3152_v15 = vld [vmem:[%s3080_s7 + $0xc9] sm:$0xff]  ;;  %v3167_v18 = vld [vmem:[%s3080_s7 + $0xf1] sm:$0xff]  ;;  %v3170_v19 = vld [vmem:[%s3080_s7 + $0xe1] sm:$0xff] }
  0x22   : > { %v3173_v20 = vld [vmem:[%s3080_s7 + $0xd9] sm:$0xff]  ;;  %v3182_v21 = vld [vmem:[%s3080_s7 + $0x111] sm:$0xff]  ;;  %v3185_v22 = vld [vmem:[%s3080_s7 + $0x109] sm:$0xff] }
  0x23   : > { %v3188_v23 = vld [vmem:[%s3080_s7 + $0xf9] sm:$0xff]  ;;  %v3200_v25 = vld [vmem:[%s3080_s7 + $0x129] sm:$0xff]  ;;  %v3203_v26 = vld [vmem:[%s3080_s7 + $0x121] sm:$0xff] }
  0x24   : > { %609 = vrot.lane.b32.xlu2 %v3095_v3, %s2983_s8  ;;  %605 = vrot.lane.b32.xlu1 %v3098_v4, %s2983_s8  ;;  %v3197_v24 = vld [vmem:[%s3080_s7 + $0x139] sm:$0xff]  ;;  %v3215_v28 = vld [vmem:[%s3080_s7 + $0x151] sm:$0xff] }
  0x25   : > { %601 = vrot.lane.b32.xlu0 %v310_v5, %s2983_s8  ;;  %v3212_v27 = vld [vmem:[%s3080_s7 + $0x159] sm:$0xff]  ;;  %v3218_v29 = vld [vmem:[%s3080_s7 + $0x141] sm:$0xff]  ;;  %v3228_v31 = vld [vmem:[%s3080_s7 + $0x171] sm:$0xff] }
  0x26   : > { %v341_v30 = vld [vmem:[%s3080_s7 + $0x2] sm:$0xff]  ;;  %v3242_v34 = vld [vmem:[%s3080_s7 + $0x1a] sm:$0xff]  ;;  %v342_v35 = vld [vmem:[%s3080_s7 + $0xa] sm:$0xff] }
  0x27   : > { %v3231_v32 = vld [vmem:[%s3080_s7 + $0x169] sm:$0xff]  ;;  %v3256_v38 = vld [vmem:[%s3080_s7 + $0x3a] sm:$0xff]  ;;  %v3259_v39 = vld [vmem:[%s3080_s7 + $0x32] sm:$0xff] }
  0x28   : > { %v3239_v33 = vld [vmem:[%s3080_s7 + $0x22] sm:$0xff]  ;;  %v3253_v37 = vld [vmem:[%s3080_s7 + $0x4a] sm:$0xff]  ;;  %v3276_v43 = vld [vmem:[%s3080_s7 + $0x52] sm:$0xff] }
  0x29   : > { %v3270_v41 = vld [vmem:[%s3080_s7 + $0x6a] sm:$0xff]  ;;  %v3273_v42 = vld [vmem:[%s3080_s7 + $0x62] sm:$0xff]  ;;  %v3287_v45 = vld [vmem:[%s3080_s7 + $0x92] sm:$0xff] }
  0x2a   : > { %v3290_v46 = vld [vmem:[%s3080_s7 + $0x82] sm:$0xff]  ;;  %v3293_v47 = vld [vmem:[%s3080_s7 + $0x7a] sm:$0xff]  ;;  %v3308_v51 = vld [vmem:[%s3080_s7 + $0xb2] sm:$0xff] }
  0x2b   : > { %v3311_v52 = vld [vmem:[%s3080_s7 + $0xaa] sm:$0xff]  ;;  %v3314_v53 = vld [vmem:[%s3080_s7 + $0x9a] sm:$0xff]  ;;  %v3335_v59 = vld [vmem:[%s3080_s7 + $0xc2] sm:$0xff] }
  0x2c   : > { %615 = vrot.lane.b32.xlu2 %v3107_v6, %s2983_s8  ;;  %613 = vrot.lane.b32.xlu1 %v3110_v7, %s2983_s8  ;;  %v3329_v57 = vld [vmem:[%s3080_s7 + $0xda] sm:$0xff]  ;;  %v3332_v58 = vld [vmem:[%s3080_s7 + $0xca] sm:$0xff] }
  0x2d   : > { %611 = vrot.lane.b32.xlu0 %v3113_v8, %s2983_s8  ;;  %v3350_v63 = vld [vmem:[%s3080_s7 + $0xfa] sm:$0xff]  ;;  %v3353_v2 = vld [vmem:[%s3080_s7 + $0xf2] sm:$0xff]  ;;  %v3356_v5 = vld [vmem:[%s3080_s7 + $0xe2] sm:$0xff] }
  0x34   : > { %621 = vrot.lane.b32.xlu2 %v3122_v9, %s2983_s8  ;;  %619 = vrot.lane.b32.xlu1 %v3125_v10, %s2983_s8 }
  0x35   : > { %617 = vrot.lane.b32.xlu0 %v3128_v11, %s2983_s8 }
  0x3c   : > { %627 = vrot.lane.b32.xlu2 %v3137_v12, %s2983_s8  ;;  %625 = vrot.lane.b32.xlu1 %v3140_v13, %s2983_s8 }
  0x3d   : > { %623 = vrot.lane.b32.xlu0 %v3143_v14, %s2983_s8 }
  0x44   : > { %633 = vrot.lane.b32.xlu2 %v3152_v15, %s2983_s8  ;;  %631 = vrot.lane.b32.xlu1 %v3155_v16, %s2983_s8 }
  0x45   : > { %629 = vrot.lane.b32.xlu0 %v3158_v17, %s2983_s8 }
  0x4c   : > { %639 = vrot.lane.b32.xlu2 %v3167_v18, %s2983_s8  ;;  %637 = vrot.lane.b32.xlu1 %v3170_v19, %s2983_s8 }
  0x4d   : > { %635 = vrot.lane.b32.xlu0 %v3173_v20, %s2983_s8 }
  0x54   : > { %645 = vrot.lane.b32.xlu2 %v3182_v21, %s2983_s8  ;;  %643 = vrot.lane.b32.xlu1 %v3185_v22, %s2983_s8 }
  0x55   : > { %641 = vrot.lane.b32.xlu0 %v3188_v23, %s2983_s8 }
  0x5c   : > { %651 = vrot.lane.b32.xlu2 %v3197_v24, %s2983_s8  ;;  %649 = vrot.lane.b32.xlu1 %v3200_v25, %s2983_s8 }
  0x5d   : > { %647 = vrot.lane.b32.xlu0 %v3203_v26, %s2983_s8 }
  0x64   : > { %657 = vrot.lane.b32.xlu2 %v3212_v27, %s2983_s8  ;;  %655 = vrot.lane.b32.xlu1 %v3215_v28, %s2983_s8 }
  0x65   : > { %653 = vrot.lane.b32.xlu0 %v3218_v29, %s2983_s8 }
  0x6c   : > { %727 = vrot.lane.b32.xlu2 %v341_v30, %s2984_s9  ;;  %661 = vrot.lane.b32.xlu1 %v3228_v31, %s2983_s8 }
  0x6d   : > { %659 = vrot.lane.b32.xlu0 %v3231_v32, %s2983_s8 }
  0x74   : > { %733 = vrot.lane.b32.xlu2 %v3239_v33, %s2984_s9  ;;  %731 = vrot.lane.b32.xlu1 %v3242_v34, %s2984_s9 }
  0x75   : > { %729 = vrot.lane.b32.xlu0 %v342_v35, %s2984_s9 }
  0x76   : > { %v3250_v36 = vpop.permute.xlu2 %607 }
  0x77   : > { %5162 = vst [vmem:[#allocation5_spill] sm:$0xff] %v3250_v36 }
  0x7c   : > { %739 = vrot.lane.b32.xlu2 %v3253_v37, %s2984_s9  ;;  %737 = vrot.lane.b32.xlu1 %v3256_v38, %s2984_s9 }
  0x7d   : > { %735 = vrot.lane.b32.xlu0 %v3259_v39, %s2984_s9 }
  0x7e   : > { %v3267_v40 = vpop.permute.xlu2 %609 }
  0x7f   : > { %5163 = vst [vmem:[#allocation6_spill] sm:$0xff] %v3267_v40  ;;  %v3374_v40 = vld [vmem:[%s3080_s7 + $0x112] sm:$0xff] }
  0x84   : > { %745 = vrot.lane.b32.xlu2 %v3270_v41, %s2984_s9  ;;  %743 = vrot.lane.b32.xlu1 %v3273_v42, %s2984_s9 }
  0x85   : > { %741 = vrot.lane.b32.xlu0 %v3276_v43, %s2984_s9 }
  0x86   : > { %v3284_v44 = vpop.permute.xlu2 %615 }
  0x87   : > { %5164 = vst [vmem:[#allocation7_spill] sm:$0xff] %v3284_v44 }
  0x8c   : > { %751 = vrot.lane.b32.xlu2 %v3287_v45, %s2984_s9  ;;  %749 = vrot.lane.b32.xlu1 %v3290_v46, %s2984_s9 }
  0x8d   : > { %747 = vrot.lane.b32.xlu0 %v3293_v47, %s2984_s9 }
  0x8e   : > { %v3301_v48 = vpop.permute.xlu2 %621  ;;  %v3303_v49 = vpop.permute.xlu1 %603 }
  0x8f   : > { %5165 = vst [vmem:[#allocation8_spill] sm:$0xff] %v3301_v48  ;;  %v3305_v50 = vpop.permute.xlu0 %599  ;;  %v3377_v48 = vld [vmem:[%s3080_s7 + $0x10a] sm:$0xff] }
  0x90   : > { %5166 = vst [vmem:[#allocation9_spill] sm:$0xff] %v3303_v49  ;;  %v3419_v49 = vld [vmem:[%s3080_s7 + $0x152] sm:$0xff] }
  0x91   : > { %5167 = vst [vmem:[#allocation10_spill] sm:$0xff] %v3305_v50  ;;  %v3392_v50 = vld [vmem:[%s3080_s7 + $0x142] sm:$0xff] }
  0x92   : > { %5180 = vst [vmem:[#allocation23_spill] sm:$0xff] %v3392_v50 }
  0x93   : > { %5186 = vst [vmem:[#allocation29_spill] sm:$0xff] %v3419_v49 }
  0x94   : > { %757 = vrot.lane.b32.xlu2 %v3308_v51, %s2984_s9  ;;  %755 = vrot.lane.b32.xlu1 %v3311_v52, %s2984_s9 }
  0x95   : > { %753 = vrot.lane.b32.xlu0 %v3314_v53, %s2984_s9 }
  0x96   : > { %v3322_v54 = vpop.permute.xlu2 %627  ;;  %v3324_v55 = vpop.permute.xlu1 %605 }
  0x97   : > { %5168 = vst [vmem:[#allocation11_spill] sm:$0xff] %v3322_v54  ;;  %v3326_v56 = vpop.permute.xlu0 %601 }
  0x98   : > { %5169 = vst [vmem:[#allocation12_spill] sm:$0xff] %v3324_v55 }
  0x99   : > { %5170 = vst [vmem:[#allocation13_spill] sm:$0xff] %v3326_v56 }
  0x9c   : > { %763 = vrot.lane.b32.xlu2 %v3329_v57, %s2984_s9  ;;  %761 = vrot.lane.b32.xlu1 %v3332_v58, %s2984_s9 }
  0x9d   : > { %759 = vrot.lane.b32.xlu0 %v3335_v59, %s2984_s9 }
  0x9e   : > { %v3343_v60 = vpop.permute.xlu2 %633  ;;  %v3345_v61 = vpop.permute.xlu1 %613 }
  0x9f   : > { %5171 = vst [vmem:[#allocation14_spill] sm:$0xff] %v3343_v60  ;;  %v3347_v62 = vpop.permute.xlu0 %611  ;;  %v3398_v60 = vld [vmem:[%s3080_s7 + $0x12a] sm:$0xff] }
  0xa0   : > { %5172 = vst [vmem:[#allocation15_spill] sm:$0xff] %v3345_v61  ;;  %v3416_v61 = vld [vmem:[%s3080_s7 + $0x15a] sm:$0xff] }
  0xa1   : > { %5173 = vst [vmem:[#allocation16_spill] sm:$0xff] %v3347_v62  ;;  %v3371_v62 = vld [vmem:[%s3080_s7 + $0x122] sm:$0xff] }
  0xa2   : > { %5185 = vst [vmem:[#allocation28_spill] sm:$0xff] %v3416_v61 }
  0xa4   : > { %769 = vrot.lane.b32.xlu2 %v3350_v63, %s2984_s9  ;;  %767 = vrot.lane.b32.xlu1 %v3353_v2, %s2984_s9 }
  0xa5   : > { %765 = vrot.lane.b32.xlu0 %v3356_v5, %s2984_s9 }
  0xa6   : > { %v3364_v30 = vpop.permute.xlu2 %639  ;;  %v3366_v35 = vpop.permute.xlu1 %619 }
  0xa7   : > { %5174 = vst [vmem:[#allocation17_spill] sm:$0xff] %v3364_v30  ;;  %v3368_v54 = vpop.permute.xlu0 %617  ;;  %v3395_v30 = vld [vmem:[%s3080_s7 + $0x13a] sm:$0xff] }
  0xa8   : > { %5175 = vst [vmem:[#allocation18_spill] sm:$0xff] %v3366_v35  ;;  %v3413_v35 = vld [vmem:[%s3080_s7 + $0x16a] sm:$0xff] }
  0xa9   : > { %5176 = vst [vmem:[#allocation19_spill] sm:$0xff] %v3368_v54 }
  0xaa   : > { %5184 = vst [vmem:[#allocation27_spill] sm:$0xff] %v3413_v35 }
  0xac   : > { %775 = vrot.lane.b32.xlu2 %v3371_v62, %s2984_s9  ;;  %773 = vrot.lane.b32.xlu1 %v3374_v40, %s2984_s9 }
  0xad   : > { %771 = vrot.lane.b32.xlu0 %v3377_v48, %s2984_s9 }
  0xae   : > { %v3385_v36 = vpop.permute.xlu2 %645  ;;  %v3387_v44 = vpop.permute.xlu1 %625 }
  0xaf   : > { %5177 = vst [vmem:[#allocation20_spill] sm:$0xff] %v3385_v36  ;;  %v3389_v56 = vpop.permute.xlu0 %623 }
  0xb0   : > { %5178 = vst [vmem:[#allocation21_spill] sm:$0xff] %v3387_v44 }
  0xb1   : > { %5179 = vst [vmem:[#allocation22_spill] sm:$0xff] %v3389_v56 }
  0xb4   : > { %781 = vrot.lane.b32.xlu2 %v3392_v50, %s2984_s9  ;;  %779 = vrot.lane.b32.xlu1 %v3395_v30, %s2984_s9  ;;  %v3434_v50 = vld [vmem:[%s3080_s7 + $0x172] sm:$0xff] }
  0xb5   : > { %777 = vrot.lane.b32.xlu0 %v3398_v60, %s2984_s9  ;;  %5190 = vst [vmem:[#allocation33_spill] sm:$0xff] %v3434_v50 }
  0xb6   : > { %v3406_v44 = vpop.permute.xlu2 %651  ;;  %v3408_v56 = vpop.permute.xlu1 %631 }
  0xb7   : > { %5181 = vst [vmem:[#allocation24_spill] sm:$0xff] %v3406_v44  ;;  %v3410_v36 = vpop.permute.xlu0 %629 }
  0xb8   : > { %5182 = vst [vmem:[#allocation25_spill] sm:$0xff] %v3408_v56  ;;  %v281_v56 = vld [vmem:[%s3080_s7 + $0x30] sm:$0xff] }
  0xb9   : > { %5183 = vst [vmem:[#allocation26_spill] sm:$0xff] %v3410_v36  ;;  %v3437_v36 = vld [vmem:[%s3080_s7 + $0x18] sm:$0xff] }
  0xba   : > { %5191 = vst [vmem:[#allocation34_spill] sm:$0xff] %v3437_v36 }
  0xbc   : > { %787 = vrot.lane.b32.xlu2 %v3413_v35, %s2984_s9  ;;  %785 = vrot.lane.b32.xlu1 %v3416_v61, %s2984_s9  ;;  %v3440_v35 = vld [vmem:[%s3080_s7 + $0x20] sm:$0xff]  ;;  %v3456_v61 = vld [vmem:[%s3080_s7 + $0x48] sm:$0xff] }
  0xbd   : > { %783 = vrot.lane.b32.xlu0 %v3419_v49, %s2984_s9  ;;  %5192 = vst [vmem:[#allocation35_spill] sm:$0xff] %v3440_v35  ;;  %v282_v49 = vld [vmem:[%s3080_s7 + $0x38] sm:$0xff] }
  0xbe   : > { %v3427_v44 = vpop.permute.xlu2 %657  ;;  %v3429_v54 = vpop.permute.xlu1 %637  ;;  %5196 = vst [vmem:[#allocation39_spill] sm:$0xff] %v3456_v61 }
  0xbf   : > { %5187 = vst [vmem:[#allocation30_spill] sm:$0xff] %v3427_v44  ;;  %v3431_v55 = vpop.permute.xlu0 %635 }
  0xc0   : > { %5188 = vst [vmem:[#allocation31_spill] sm:$0xff] %v3429_v54 }
  0xc1   : > { %5189 = vst [vmem:[#allocation32_spill] sm:$0xff] %v3431_v55 }
  0xc4   : > { %857 = vrot.lane.b32.xlu2 %v3440_v35, %s2985_s10  ;;  %855 = vrot.lane.b32.xlu1 %v3437_v36, %s2985_s10 }
  0xc5   : > { %789 = vrot.lane.b32.xlu0 %v3434_v50, %s2984_s9  ;;  %v3474_v50 = vld [vmem:[%s3080_s7 + $0x50] sm:$0xff] }
  0xc6   : > { %v3448_v44 = vpop.permute.xlu2 %727  ;;  %v3450_v55 = vpop.permute.xlu1 %643  ;;  %5201 = vst [vmem:[#allocation44_spill] sm:$0xff] %v3474_v50 }
  0xc7   : > { %5193 = vst [vmem:[#allocation36_spill] sm:$0xff] %v3448_v44  ;;  %v3452_v54 = vpop.permute.xlu0 %641 }
  0xc8   : > { %5194 = vst [vmem:[#allocation37_spill] sm:$0xff] %v3450_v55  ;;  %v3471_v55 = vld [vmem:[%s3080_s7 + $0x68] sm:$0xff] }
  0xc9   : > { %5195 = vst [vmem:[#allocation38_spill] sm:$0xff] %v3452_v54  ;;  %v285_v54 = vld [vmem:[%s3080_s7 + $0x60] sm:$0xff] }
  0xca   : > { %5200 = vst [vmem:[#allocation43_spill] sm:$0xff] %v3471_v55 }
  0xcc   : > { %863 = vrot.lane.b32.xlu2 %v3456_v61, %s2985_s10  ;;  %861 = vrot.lane.b32.xlu1 %v282_v49, %s2985_s10 }
  0xcd   : > { %859 = vrot.lane.b32.xlu0 %v281_v56, %s2985_s10 }
  0xce   : > { %v3463_v36 = vpop.permute.xlu2 %733  ;;  %v3465_v44 = vpop.permute.xlu1 %649 }
  0xcf   : > { %5197 = vst [vmem:[#allocation40_spill] sm:$0xff] %v3463_v36  ;;  %v3467_v35 = vpop.permute.xlu0 %647  ;;  %v3492_v36 = vld [vmem:[%s3080_s7 + $0x78] sm:$0xff] }
  0xd0   : > { %5198 = vst [vmem:[#allocation41_spill] sm:$0xff] %v3465_v44  ;;  %v3489_v44 = vld [vmem:[%s3080_s7 + $0x90] sm:$0xff] }
  0xd1   : > { %5199 = vst [vmem:[#allocation42_spill] sm:$0xff] %v3467_v35  ;;  %v288_v35 = vld [vmem:[%s3080_s7 + $0x80] sm:$0xff] }
  0xd2   : > { %5205 = vst [vmem:[#allocation48_spill] sm:$0xff] %v3489_v44 }
  0xd3   : > { %5206 = vst [vmem:[#allocation49_spill] sm:$0xff] %v3492_v36 }
  0xd4   : > { %869 = vrot.lane.b32.xlu2 %v3471_v55, %s2985_s10  ;;  %867 = vrot.lane.b32.xlu1 %v285_v54, %s2985_s10  ;;  %v3507_v55 = vld [vmem:[%s3080_s7 + $0xb0] sm:$0xff] }
  0xd5   : > { %865 = vrot.lane.b32.xlu0 %v3474_v50, %s2985_s10  ;;  %v291_v50 = vld [vmem:[%s3080_s7 + $0xa8] sm:$0xff]  ;;  %5210 = vst [vmem:[#allocation53_spill] sm:$0xff] %v3507_v55 }
  0xd6   : > { %v3481_v49 = vpop.permute.xlu2 %739  ;;  %v3483_v56 = vpop.permute.xlu1 %655 }
  0xd7   : > { %5202 = vst [vmem:[#allocation45_spill] sm:$0xff] %v3481_v49  ;;  %v3485_v61 = vpop.permute.xlu0 %653 }
  0xd8   : > { %5203 = vst [vmem:[#allocation46_spill] sm:$0xff] %v3483_v56 }
  0xd9   : > { %5204 = vst [vmem:[#allocation47_spill] sm:$0xff] %v3485_v61  ;;  %v3510_v61 = vld [vmem:[%s3080_s7 + $0x98] sm:$0xff] }
  0xda   : > { %5211 = vst [vmem:[#allocation54_spill] sm:$0xff] %v3510_v61 }
  0xdc   : > { %875 = vrot.lane.b32.xlu2 %v3489_v44, %s2985_s10  ;;  %873 = vrot.lane.b32.xlu1 %v288_v35, %s2985_s10  ;;  %v3530_v44 = vld [vmem:[%s3080_s7 + $0xc0] sm:$0xff] }
  0xdd   : > { %871 = vrot.lane.b32.xlu0 %v3492_v36, %s2985_s10  ;;  %5217 = vst [vmem:[#allocation60_spill] sm:$0xff] %v3530_v44 }
  0xde   : > { %v3499_v54 = vpop.permute.xlu2 %745  ;;  %v3501_v49 = vpop.permute.xlu1 %661 }
  0xdf   : > { %5207 = vst [vmem:[#allocation50_spill] sm:$0xff] %v3499_v54  ;;  %v3503_v56 = vpop.permute.xlu0 %659  ;;  %v3527_v54 = vld [vmem:[%s3080_s7 + $0xd8] sm:$0xff] }
  0xe0   : > { %5208 = vst [vmem:[#allocation51_spill] sm:$0xff] %v3501_v49  ;;  %v3524_v49 = vld [vmem:[%s3080_s7 + $0xc8] sm:$0xff] }
  0xe1   : > { %5209 = vst [vmem:[#allocation52_spill] sm:$0xff] %v3503_v56 }
  0xe2   : > { %5215 = vst [vmem:[#allocation58_spill] sm:$0xff] %v3524_v49 }
  0xe3   : > { %5216 = vst [vmem:[#allocation59_spill] sm:$0xff] %v3527_v54 }
  0xe4   : > { %881 = vrot.lane.b32.xlu2 %v3507_v55, %s2985_s10  ;;  %879 = vrot.lane.b32.xlu1 %v291_v50, %s2985_s10  ;;  %v3551_v55 = vld [vmem:[%s3080_s7 + $0xe0] sm:$0xff] }
  0xe5   : > { %877 = vrot.lane.b32.xlu0 %v3510_v61, %s2985_s10  ;;  %v3545_v61 = vld [vmem:[%s3080_s7 + $0xf0] sm:$0xff]  ;;  %5223 = vst [vmem:[#allocation66_spill] sm:$0xff] %v3551_v55 }
  0xe6   : > { %v3517_v35 = vpop.permute.xlu2 %751  ;;  %v3519_v36 = vpop.permute.xlu1 %731  ;;  %5221 = vst [vmem:[#allocation64_spill] sm:$0xff] %v3545_v61 }
  0xe7   : > { %5212 = vst [vmem:[#allocation55_spill] sm:$0xff] %v3517_v35  ;;  %v3521_v56 = vpop.permute.xlu0 %729 }
  0xe8   : > { %5213 = vst [vmem:[#allocation56_spill] sm:$0xff] %v3519_v36  ;;  %v3548_v36 = vld [vmem:[%s3080_s7 + $0xf8] sm:$0xff] }
  0xe9   : > { %5214 = vst [vmem:[#allocation57_spill] sm:$0xff] %v3521_v56 }
  0xea   : > { %5222 = vst [vmem:[#allocation65_spill] sm:$0xff] %v3548_v36 }
  0xec   : > { %887 = vrot.lane.b32.xlu2 %v3527_v54, %s2985_s10  ;;  %885 = vrot.lane.b32.xlu1 %v3524_v49, %s2985_s10  ;;  %v3566_v54 = vld [vmem:[%s3080_s7 + $0x110] sm:$0xff] }
  0xed   : > { %883 = vrot.lane.b32.xlu0 %v3530_v44, %s2985_s10  ;;  %5227 = vst [vmem:[#allocation70_spill] sm:$0xff] %v3566_v54  ;;  %v3572_v44 = vld [vmem:[%s3080_s7 + $0x108] sm:$0xff] }
  0xee   : > { %v3538_v50 = vpop.permute.xlu2 %757  ;;  %v3540_v35 = vpop.permute.xlu1 %737  ;;  %5229 = vst [vmem:[#allocation72_spill] sm:$0xff] %v3572_v44 }
  0xef   : > { %5218 = vst [vmem:[#allocation61_spill] sm:$0xff] %v3538_v50  ;;  %v3542_v56 = vpop.permute.xlu0 %735  ;;  %v3569_v50 = vld [vmem:[%s3080_s7 + $0x120] sm:$0xff] }
  0xf0   : > { %5219 = vst [vmem:[#allocation62_spill] sm:$0xff] %v3540_v35 }
  0xf1   : > { %5220 = vst [vmem:[#allocation63_spill] sm:$0xff] %v3542_v56 }
  0xf2   : > { %5228 = vst [vmem:[#allocation71_spill] sm:$0xff] %v3569_v50 }
  0xf4   : > { %893 = vrot.lane.b32.xlu2 %v3548_v36, %s2985_s10  ;;  %891 = vrot.lane.b32.xlu1 %v3545_v61, %s2985_s10 }
  0xf5   : > { %889 = vrot.lane.b32.xlu0 %v3551_v55, %s2985_s10  ;;  %v3593_v55 = vld [vmem:[%s3080_s7 + $0x128] sm:$0xff] }
  0xf6   : > { %v3559_v35 = vpop.permute.xlu2 %763  ;;  %v3561_v56 = vpop.permute.xlu1 %743  ;;  %5235 = vst [vmem:[#allocation78_spill] sm:$0xff] %v3593_v55 }
  0xf7   : > { %5224 = vst [vmem:[#allocation67_spill] sm:$0xff] %v3559_v35  ;;  %v3563_v49 = vpop.permute.xlu0 %741  ;;  %v3590_v35 = vld [vmem:[%s3080_s7 + $0x140] sm:$0xff] }
  0xf8   : > { %5225 = vst [vmem:[#allocation68_spill] sm:$0xff] %v3561_v56 }
  0xf9   : > { %5226 = vst [vmem:[#allocation69_spill] sm:$0xff] %v3563_v49  ;;  %v3587_v49 = vld [vmem:[%s3080_s7 + $0x138] sm:$0xff] }
  0xfa   : > { %5233 = vst [vmem:[#allocation76_spill] sm:$0xff] %v3587_v49 }
  0xfb   : > { %5234 = vst [vmem:[#allocation77_spill] sm:$0xff] %v3590_v35 }
  0xfc   : > { %899 = vrot.lane.b32.xlu2 %v3569_v50, %s2985_s10  ;;  %897 = vrot.lane.b32.xlu1 %v3566_v54, %s2985_s10  ;;  %v3611_v50 = vld [vmem:[%s3080_s7 + $0x168] sm:$0xff] }
  0xfd   : > { %895 = vrot.lane.b32.xlu0 %v3572_v44, %s2985_s10  ;;  %5240 = vst [vmem:[#allocation83_spill] sm:$0xff] %v3611_v50  ;;  %v3614_v44 = vld [vmem:[%s3080_s7 + $0x150] sm:$0xff] }
  0xfe   : > { %v3580_v56 = vpop.permute.xlu2 %769  ;;  %v3582_v61 = vpop.permute.xlu1 %749  ;;  %5241 = vst [vmem:[#allocation84_spill] sm:$0xff] %v3614_v44 }
  0xff   : > { %5230 = vst [vmem:[#allocation73_spill] sm:$0xff] %v3580_v56  ;;  %v3584_v36 = vpop.permute.xlu0 %747  ;;  %v3608_v56 = vld [vmem:[%s3080_s7 + $0x158] sm:$0xff] }
 0x100   : > { %5231 = vst [vmem:[#allocation74_spill] sm:$0xff] %v3582_v61 }
 0x101   : > { %5232 = vst [vmem:[#allocation75_spill] sm:$0xff] %v3584_v36 }
 0x102   : > { %5239 = vst [vmem:[#allocation82_spill] sm:$0xff] %v3608_v56 }
 0x104   : > { %905 = vrot.lane.b32.xlu2 %v3590_v35, %s2985_s10  ;;  %903 = vrot.lane.b32.xlu1 %v3587_v49, %s2985_s10  ;;  %v2610_v35 = vld [vmem:[%s3080_s7 + $0x188] sm:$0xff] }
 0x105   : > { %901 = vrot.lane.b32.xlu0 %v3593_v55, %s2985_s10  ;;  %v3631_v55 = vld [vmem:[%s3080_s7 + $0x170] sm:$0xff] }
 0x106   : > { %v3601_v61 = vpop.permute.xlu2 %775  ;;  %v3603_v54 = vpop.permute.xlu1 %755 }
 0x107   : > { %5236 = vst [vmem:[#allocation79_spill] sm:$0xff] %v3601_v61  ;;  %v3605_v36 = vpop.permute.xlu0 %753  ;;  %v2609_v61 = vld [vmem:[%s3080_s7 + $0x180] sm:$0xff] }
 0x108   : > { %5237 = vst [vmem:[#allocation80_spill] sm:$0xff] %v3603_v54 }
 0x109   : > { %5238 = vst [vmem:[#allocation81_spill] sm:$0xff] %v3605_v36 }
 0x10c   : > { %911 = vrot.lane.b32.xlu2 %v3611_v50, %s2985_s10  ;;  %909 = vrot.lane.b32.xlu1 %v3608_v56, %s2985_s10 }
 0x10d   : > { %907 = vrot.lane.b32.xlu0 %v3614_v44, %s2985_s10 }
 0x10e   : > { %v3622_v49 = vpop.permute.xlu2 %781  ;;  %v3624_v54 = vpop.permute.xlu1 %761 }
 0x10f   : > { %5242 = vst [vmem:[#allocation85_spill] sm:$0xff] %v3624_v54  ;;  %v3626_v36 = vpop.permute.xlu0 %759 }
 0x114   : > { %917 = vrot.lane.b32.xlu2 %v2610_v35, %s2985_s10  ;;  %915 = vrot.lane.b32.xlu1 %v2609_v61, %s2985_s10 }
 0x115   : > { %913 = vrot.lane.b32.xlu0 %v3631_v55, %s2985_s10  ;;  %s2461_s10 = sshll.u32 %s2457_s6, 4  ;;  %s2462_s10 = int_to_ptr.hbm [resolvable:$true] %s2461_s10 }
 0x116   : > { %v3637_v56 = vpop.permute.xlu2 %787  ;;  %v3639_v44 = vpop.permute.xlu1 %767 }
 0x117   : > { %v3641_v50 = vpop.permute.xlu0 %765 }
 0x11c   : > { %987 = vrot.lane.b32.xlu2 %v3083_v0, %s2986_s11  ;;  %985 = vrot.lane.b32.xlu1 %v3098_v4, %s2986_s11 }
 0x11d   : > { %983 = vrot.lane.b32.xlu0 %v3086_v1, %s2986_s11 }
 0x11e   : > { %v3649_v61 = vpop.permute.xlu2 %857  ;;  %v3651_v35 = vpop.permute.xlu1 %773 }
 0x11f   : > { %v3653_v54 = vpop.permute.xlu0 %771 }
 0x124   : > { %993 = vrot.lane.b32.xlu2 %v3110_v7, %s2986_s11  ;;  %991 = vrot.lane.b32.xlu1 %v3113_v8, %s2986_s11 }
 0x125   : > { %989 = vrot.lane.b32.xlu0 %v3095_v3, %s2986_s11 }
 0x126   : > { %v3661_v0 = vpop.permute.xlu2 %863  ;;  %v3663_v4 = vpop.permute.xlu1 %779 }
 0x127   : > { %5243 = vst [vmem:[#allocation86_spill] sm:$0xff] %v3661_v0  ;;  %v3665_v1 = vpop.permute.xlu0 %777 }
 0x12c   : > { %999 = vrot.lane.b32.xlu2 %v3125_v10, %s2986_s11  ;;  %997 = vrot.lane.b32.xlu1 %v3128_v11, %s2986_s11 }
 0x12d   : > { %995 = vrot.lane.b32.xlu0 %v3107_v6, %s2986_s11 }
 0x12e   : > { %v3673_v7 = vpop.permute.xlu2 %869  ;;  %v3675_v8 = vpop.permute.xlu1 %785 }
 0x12f   : > { %v3677_v3 = vpop.permute.xlu0 %783 }
 0x134   : > { %1005 = vrot.lane.b32.xlu2 %v3140_v13, %s2986_s11  ;;  %1003 = vrot.lane.b32.xlu1 %v3143_v14, %s2986_s11 }
 0x135   : > { %1001 = vrot.lane.b32.xlu0 %v3122_v9, %s2986_s11 }
 0x136   : > { %v3685_v10 = vpop.permute.xlu2 %875  ;;  %v3687_v11 = vpop.permute.xlu1 %855 }
 0x137   : > { %v3689_v6 = vpop.permute.xlu0 %789 }
 0x13c   : > { %1011 = vrot.lane.b32.xlu2 %v3155_v16, %s2986_s11  ;;  %1009 = vrot.lane.b32.xlu1 %v3158_v17, %s2986_s11 }
 0x13d   : > { %1007 = vrot.lane.b32.xlu0 %v3137_v12, %s2986_s11 }
 0x13e   : > { %v3697_v13 = vpop.permute.xlu2 %881  ;;  %v3699_v14 = vpop.permute.xlu1 %861 }
 0x13f   : > { %5244 = vst [vmem:[#allocation87_spill] sm:$0xff] %v3697_v13  ;;  %v3701_v9 = vpop.permute.xlu0 %859  ;;  %v2642_v13 = vld [vmem:[%s3080_s7 + $0x189] sm:$0xff] }
 0x144   : > { %1017 = vrot.lane.b32.xlu2 %v3170_v19, %s2986_s11  ;;  %1015 = vrot.lane.b32.xlu1 %v3173_v20, %s2986_s11 }
 0x145   : > { %1013 = vrot.lane.b32.xlu0 %v3152_v15, %s2986_s11 }
 0x146   : > { %v3709_v16 = vpop.permute.xlu2 %887  ;;  %v3711_v17 = vpop.permute.xlu1 %867 }
 0x147   : > { %5245 = vst [vmem:[#allocation88_spill] sm:$0xff] %v3711_v17  ;;  %v3713_v12 = vpop.permute.xlu0 %865  ;;  %v2641_v17 = vld [vmem:[%s3080_s7 + $0x181] sm:$0xff] }
 0x148   : > { %5246 = vst [vmem:[#allocation89_spill] sm:$0xff] %v3713_v12 }
 0x14c   : > { %1023 = vrot.lane.b32.xlu2 %v3185_v22, %s2986_s11  ;;  %1021 = vrot.lane.b32.xlu1 %v3188_v23, %s2986_s11 }
 0x14d   : > { %1019 = vrot.lane.b32.xlu0 %v3167_v18, %s2986_s11 }
 0x14e   : > { %v3721_v19 = vpop.permute.xlu2 %893  ;;  %v3723_v20 = vpop.permute.xlu1 %873 }
 0x14f   : > { %v3725_v15 = vpop.permute.xlu0 %871 }
 0x154   : > { %1029 = vrot.lane.b32.xlu2 %v3200_v25, %s2986_s11  ;;  %1027 = vrot.lane.b32.xlu1 %v3203_v26, %s2986_s11 }
 0x155   : > { %1025 = vrot.lane.b32.xlu0 %v3182_v21, %s2986_s11 }
 0x156   : > { %v3733_v22 = vpop.permute.xlu2 %899  ;;  %v3735_v18 = vpop.permute.xlu1 %879 }
 0x157   : > { %5247 = vst [vmem:[#allocation90_spill] sm:$0xff] %v3735_v18  ;;  %v3737_v23 = vpop.permute.xlu0 %877  ;;  %v5263_v18 = vld [vmem:[#allocation53_spill] sm:$0xff] }
 0x158   : > { %5248 = vst [vmem:[#allocation91_spill] sm:$0xff] %v3737_v23  ;;  %v5278_v23 = vld [vmem:[#allocation35_spill] sm:$0xff] }
 0x15c   : > { %1035 = vrot.lane.b32.xlu2 %v3215_v28, %s2986_s11  ;;  %1033 = vrot.lane.b32.xlu1 %v3218_v29, %s2986_s11 }
 0x15d   : > { %1031 = vrot.lane.b32.xlu0 %v3197_v24, %s2986_s11 }
 0x15e   : > { %v3745_v25 = vpop.permute.xlu2 %905  ;;  %v3747_v21 = vpop.permute.xlu1 %885 }
 0x15f   : > { %v3749_v26 = vpop.permute.xlu0 %883 }
 0x160   : > { %5249 = vst [vmem:[#allocation92_spill] sm:$0xff] %v3749_v26  ;;  %v5259_v26 = vld [vmem:[#allocation60_spill] sm:$0xff] }
 0x164   : > { %1041 = vrot.lane.b32.xlu2 %v3228_v31, %s2986_s11  ;;  %1039 = vrot.lane.b32.xlu1 %v3231_v32, %s2986_s11 }
 0x165   : > { %1037 = vrot.lane.b32.xlu0 %v3212_v27, %s2986_s11 }
 0x166   : > { %v3757_v28 = vpop.permute.xlu2 %911  ;;  %v3759_v29 = vpop.permute.xlu1 %891 }
 0x167   : > { %v3761_v24 = vpop.permute.xlu0 %889 }
 0x16c   : > { %1111 = vrot.lane.b32.xlu2 %v3242_v34, %s2987_s12  ;;  %1045 = vrot.lane.b32.xlu1 %v2642_v13, %s2986_s11 }
 0x16d   : > { %1043 = vrot.lane.b32.xlu0 %v2641_v17, %s2986_s11 }
 0x16e   : > { %v3769_v31 = vpop.permute.xlu2 %917  ;;  %v3771_v32 = vpop.permute.xlu1 %897 }
 0x16f   : > { %v3773_v27 = vpop.permute.xlu0 %895 }
 0x174   : > { %1117 = vrot.lane.b32.xlu2 %v3256_v38, %s2987_s12  ;;  %1115 = vrot.lane.b32.xlu1 %v3259_v39, %s2987_s12 }
 0x175   : > { %1113 = vrot.lane.b32.xlu0 %v3239_v33, %s2987_s12 }
 0x176   : > { %v3781_v34 = vpop.permute.xlu2 %987  ;;  %v3783_v13 = vpop.permute.xlu1 %903 }
 0x177   : > { %v3785_v17 = vpop.permute.xlu0 %901 }
 0x17c   : > { %1123 = vrot.lane.b32.xlu2 %v3273_v42, %s2987_s12  ;;  %1121 = vrot.lane.b32.xlu1 %v3276_v43, %s2987_s12 }
 0x17d   : > { %1119 = vrot.lane.b32.xlu0 %v3253_v37, %s2987_s12 }
 0x17e   : > { %v3793_v38 = vpop.permute.xlu2 %993  ;;  %v3795_v39 = vpop.permute.xlu1 %909 }
 0x17f   : > { %5250 = vst [vmem:[#allocation93_spill] sm:$0xff] %v3793_v38  ;;  %v3797_v33 = vpop.permute.xlu0 %907 }
 0x184   : > { %1129 = vrot.lane.b32.xlu2 %v3290_v46, %s2987_s12  ;;  %1127 = vrot.lane.b32.xlu1 %v3293_v47, %s2987_s12 }
 0x185   : > { %1125 = vrot.lane.b32.xlu0 %v3270_v41, %s2987_s12 }
 0x186   : > { %v3805_v42 = vpop.permute.xlu2 %999  ;;  %v3807_v43 = vpop.permute.xlu1 %915 }
 0x187   : > { %5251 = vst [vmem:[#allocation94_spill] sm:$0xff] %v3805_v42  ;;  %v3809_v37 = vpop.permute.xlu0 %913 }
 0x18c   : > { %1135 = vrot.lane.b32.xlu2 %v3311_v52, %s2987_s12  ;;  %1133 = vrot.lane.b32.xlu1 %v3314_v53, %s2987_s12 }
 0x18d   : > { %1131 = vrot.lane.b32.xlu0 %v3287_v45, %s2987_s12 }
 0x18e   : > { %v3817_v46 = vpop.permute.xlu2 %1005  ;;  %v3819_v47 = vpop.permute.xlu1 %985 }
 0x18f   : > { %5252 = vst [vmem:[#allocation95_spill] sm:$0xff] %v3817_v46  ;;  %v3821_v41 = vpop.permute.xlu0 %983 }
 0x194   : > { %1141 = vrot.lane.b32.xlu2 %v3332_v58, %s2987_s12  ;;  %1139 = vrot.lane.b32.xlu1 %v3335_v59, %s2987_s12 }
 0x195   : > { %1137 = vrot.lane.b32.xlu0 %v3308_v51, %s2987_s12 }
 0x196   : > { %v3829_v52 = vpop.permute.xlu2 %1011  ;;  %v3831_v53 = vpop.permute.xlu1 %991 }
 0x197   : > { %5253 = vst [vmem:[#allocation96_spill] sm:$0xff] %v3829_v52  ;;  %v3833_v45 = vpop.permute.xlu0 %989  ;;  %v5258_v52 = vld [vmem:[#allocation25_spill] sm:$0xff] }
 0x198   : > { %5254 = vst [vmem:[#allocation97_spill] sm:$0xff] %v3831_v53  ;;  %v5280_v53 = vld [vmem:[#allocation41_spill] sm:$0xff] }
 0x19c   : > { %1147 = vrot.lane.b32.xlu2 %v3353_v2, %s2987_s12  ;;  %1145 = vrot.lane.b32.xlu1 %v3356_v5, %s2987_s12 }
 0x19d   : > { %1143 = vrot.lane.b32.xlu0 %v3329_v57, %s2987_s12 }
 0x19e   : > { %v3841_v58 = vpop.permute.xlu2 %1017  ;;  %v3843_v59 = vpop.permute.xlu1 %997 }
 0x19f   : > { %v3845_v51 = vpop.permute.xlu0 %995 }
 0x1a0   : > { %5255 = vst [vmem:[#allocation98_spill] sm:$0xff] %v3845_v51  ;;  %v1608_v51 = vsel %vm1591_vm0, %v5259_v26, %v5258_v52  ;;  %v5265_v26 = vld [vmem:[#allocation61_spill] sm:$0xff] }
 0x1a4   : > { %1153 = vrot.lane.b32.xlu2 %v3374_v40, %s2987_s12  ;;  %1151 = vrot.lane.b32.xlu1 %v3377_v48, %s2987_s12 }
 0x1a5   : > { %1149 = vrot.lane.b32.xlu0 %v3350_v63, %s2987_s12 }
 0x1a6   : > { %v3853_v2 = vpop.permute.xlu2 %1023  ;;  %v3855_v5 = vpop.permute.xlu1 %1003 }
 0x1a7   : > { %v3857_v57 = vpop.permute.xlu0 %1001 }
 0x1ac   : > { %1159 = vrot.lane.b32.xlu2 %v3395_v30, %s2987_s12  ;;  %1157 = vrot.lane.b32.xlu1 %v3398_v60, %s2987_s12  ;;  %v5260_v30 = vld [vmem:[#allocation28_spill] sm:$0xff]  ;;  %v5261_v60 = vld [vmem:[#allocation29_spill] sm:$0xff] }
 0x1ad   : > { %1155 = vrot.lane.b32.xlu0 %v3371_v62, %s2987_s12  ;;  %v5262_v62 = vld [vmem:[#allocation26_spill] sm:$0xff] }
 0x1ae   : > { %v3865_v40 = vpop.permute.xlu2 %1029  ;;  %v3867_v48 = vpop.permute.xlu1 %1009  ;;  %v1607_v38 = vsel %vm1591_vm0, %v5263_v18, %v5262_v62 }
 0x1af   : > { %5256 = vst [vmem:[#allocation99_spill] sm:$0xff] %v3867_v48  ;;  %v3869_v63 = vpop.permute.xlu0 %1007  ;;  %v1641_v48 = vsel %vm1624_vm1, %v1608_v51, %v3626_v36  ;;  %v1640_v52 = vsel %vm1624_vm1, %v1607_v38, %v5265_v26  ;;  %v5267_v38 = vld [vmem:[#allocation31_spill] sm:$0xff]  ;;  %v5268_v26 = vld [vmem:[#allocation66_spill] sm:$0xff] }
 0x1b0   : > { %5257 = vst [vmem:[#allocation100_spill] sm:$0xff] %v3869_v63  ;;  %v5264_v63 = vld [vmem:[#allocation23_spill] sm:$0xff]  ;;  %v1673_v18 = vsel %vm1657_vm2, %v1640_v52, %v3747_v21  ;;  %v5269_v21 = vld [vmem:[#allocation33_spill] sm:$0xff] }
 0x1b1   : > { %v5271_v52 = vld [vmem:[#allocation59_spill] sm:$0xff] }
 0x1b4   : > { %1165 = vrot.lane.b32.xlu2 %v5260_v30, %s2987_s12  ;;  %1163 = vrot.lane.b32.xlu1 %v5261_v60, %s2987_s12  ;;  %v1674_v30 = vsel %vm1657_vm2, %v1641_v48, %v3709_v16  ;;  %v1611_v16 = vsel %vm1591_vm0, %v5268_v26, %v5267_v38  ;;  %v5270_v48 = vld [vmem:[#allocation32_spill] sm:$0xff] }
 0x1b5   : > { %1161 = vrot.lane.b32.xlu0 %v5264_v63, %s2987_s12  ;;  %v3900_v63 = vld [vmem:[%s3080_s7 + $0x182] sm:$0xff] }
 0x1b6   : > { %v3889_v12 = vpop.permute.xlu2 %1035  ;;  %v1016_v60 = vpop.permute.xlu1 %1015  ;;  %5266 = vst [vmem:[#allocation25_spill] sm:$0xff] %v3900_v63 }
 0x1b7   : > { %v3894_v62 = vsel %vm1690_vm3, %v1674_v30, %v1016_v60  ;;  %v1014_v36 = vpop.permute.xlu0 %1013  ;;  %v1610_v30 = vsel %vm1591_vm0, %v5271_v52, %v5270_v48  ;;  %v1644_v60 = vsel %vm1624_vm1, %v1611_v16, %v3641_v50  ;;  %v2707_v16 = vld [vmem:[%s3080_s7 + $0x31] sm:$0xff] }
 0x1b8   : > { %v3897_v51 = vsel %vm1690_vm3, %v1673_v18, %v1014_v36  ;;  %v5272_v18 = vld [vmem:[#allocation27_spill] sm:$0xff]  ;;  %v1677_v26 = vsel %vm1657_vm2, %v1644_v60, %v3721_v19  ;;  %v5275_v19 = vld [vmem:[#allocation37_spill] sm:$0xff]  ;;  %v5276_v60 = vld [vmem:[#allocation72_spill] sm:$0xff] }
 0x1b9   : > { %v5273_v36 = vld [vmem:[#allocation67_spill] sm:$0xff] }
 0x1ba   : > { %v1643_v38 = vsel %vm1624_vm1, %v1610_v30, %v5273_v36  ;;  %v2675_v30 = vld [vmem:[%s3080_s7 + $0x30] sm:$0xff]  ;;  %v1614_v36 = vsel %vm1591_vm0, %v5276_v60, %v5275_v19  ;;  %v2676_v19 = vld [vmem:[%s3080_s7 + $0x38] sm:$0xff]  ;;  %v5277_v60 = vld [vmem:[#allocation12_spill] sm:$0xff] }
 0x1bc   : > { %1171 = vrot.lane.b32.xlu2 %v3900_v63, %s2987_s12  ;;  %1169 = vrot.lane.b32.xlu1 %v5269_v21, %s2987_s12  ;;  %v1676_v21 = vsel %vm1657_vm2, %v1643_v38, %v3759_v29  ;;  %v1647_v29 = vsel %vm1624_vm1, %v1614_v36, %v3653_v54  ;;  %v1595_v54 = vsel %vm1591_vm0, %v5278_v23, %v5277_v60  ;;  %v5279_v36 = vld [vmem:[#allocation40_spill] sm:$0xff]  ;;  %v5284_v60 = vld [vmem:[#allocation79_spill] sm:$0xff] }
 0x1bd   : > { %1167 = vrot.lane.b32.xlu0 %v5272_v18, %s2987_s12  ;;  %v3933_v18 = vld [vmem:[%s3080_s7 + $0x18a] sm:$0xff] }
 0x1be   : > { %v3920_v63 = vpop.permute.xlu2 %1041  ;;  %v1022_v46 = vpop.permute.xlu1 %1021  ;;  %5274 = vst [vmem:[#allocation60_spill] sm:$0xff] %v3933_v18 }
 0x1bf   : > { %v3925_v48 = vsel %vm1690_vm3, %v1677_v26, %v1022_v46  ;;  %v1020_v52 = vpop.permute.xlu0 %1019  ;;  %v1680_v46 = vsel %vm1657_vm2, %v1647_v29, %v3733_v22  ;;  %v5281_v22 = vld [vmem:[#allocation78_spill] sm:$0xff] }
 0x1c0   : > { %v3928_v50 = vsel %vm1690_vm3, %v1676_v21, %v1020_v52  ;;  %v1617_v29 = vsel %vm1591_vm0, %v5281_v22, %v5280_v53  ;;  %v5288_v22 = vld [vmem:[#allocation77_spill] sm:$0xff] }
 0x1c1   : > { %v1650_v42 = vsel %vm1624_vm1, %v1617_v29, %v3665_v1 }
 0x1c4   : > { %1367 = vrot.lane.b32.xlu2 %v2707_v16, %s2988_s13  ;;  %1239 = vrot.lane.b32.xlu1 %v2675_v30, %s2989_s14  ;;  %v2708_v16 = vld [vmem:[%s3080_s7 + $0x39] sm:$0xff] }
 0x1c5   : > { %1173 = vrot.lane.b32.xlu0 %v3933_v18, %s2987_s12  ;;  %v2739_v30 = vld [vmem:[%s3080_s7 + $0x32] sm:$0xff]  ;;  %v1628_v18 = vsel %vm1624_vm1, %v1595_v54, %v5279_v36 }
 0x1c6   : > { %v3946_v38 = vpop.permute.xlu2 %1111  ;;  %v1028_v26 = vpop.permute.xlu1 %1027  ;;  %v1661_v23 = vsel %vm1657_vm2, %v1628_v18, %v3699_v14 }
 0x1c7   : > { %v3949_v21 = vsel %vm1690_vm3, %v1680_v46, %v1028_v26  ;;  %v3951_v52 = vpop.permute.xlu0 %1025  ;;  %v5282_v46 = vld [vmem:[#allocation42_spill] sm:$0xff]  ;;  %v5283_v26 = vld [vmem:[#allocation71_spill] sm:$0xff] }
 0x1c8   : > { %v1616_v0 = vsel %vm1591_vm0, %v5283_v26, %v5282_v46 }
 0x1c9   : > { %v1649_v53 = vsel %vm1624_vm1, %v1616_v0, %v5284_v60 }
 0x1ca   : > { %v1682_v1 = vsel %vm1657_vm2, %v1649_v53, %v3783_v13  ;;  %v5287_v13 = vld [vmem:[#allocation47_spill] sm:$0xff] }
 0x1cb   : > { %v1619_v29 = vsel %vm1591_vm0, %v5288_v22, %v5287_v13  ;;  %v5294_v22 = vld [vmem:[#allocation83_spill] sm:$0xff] }
 0x1cc   : > { %1369 = vrot.lane.b32.xlu2 %v2708_v16, %s2988_s13  ;;  %1241 = vrot.lane.b32.xlu1 %v2676_v19, %s2989_s14  ;;  %v1683_v16 = vsel %vm1657_vm2, %v1650_v42, %v3745_v25  ;;  %v1694_v19 = vsel %vm1690_vm3, %v1661_v23, %v3833_v45  ;;  %v2740_v42 = vld [vmem:[%s3080_s7 + $0x3a] sm:$0xff]  ;;  %v5285_v45 = vld [vmem:[#allocation48_spill] sm:$0xff]  ;;  %v1652_v46 = vsel %vm1624_vm1, %v1619_v29, %v3622_v49 }
 0x1cd   : > { %1495 = vrot.lane.b32.xlu0 %v2739_v30, %s2990_s21  ;;  %v5286_v30 = vld [vmem:[#allocation39_spill] sm:$0xff]  ;;  %v1685_v60 = vsel %vm1657_vm2, %v1652_v46, %v3795_v39  ;;  %v5293_v39 = vld [vmem:[#allocation52_spill] sm:$0xff] }
 0x1ce   : > { %v1118_v54 = vpop.permute.xlu2 %1117  ;;  %v1034_v36 = vpop.permute.xlu1 %1033  ;;  %v1622_v29 = vsel %vm1591_vm0, %v5294_v22, %v5293_v39 }
 0x1cf   : > { %v3983_v14 = vsel %vm1723_vm4, %v1694_v19, %v1118_v54  ;;  %v3986_v18 = vsel %vm1690_vm3, %v1683_v16, %v1034_v36  ;;  %v1032_v0 = vpop.permute.xlu0 %1031  ;;  %v2741_v19 = vld [vmem:[%s3080_s7 + $0x4a] sm:$0xff] }
 0x1d0   : > { %v3989_v25 = vsel %vm1690_vm3, %v1682_v1, %v1032_v0  ;;  %v2715_v54 = vld [vmem:[%s3080_s7 + $0x91] sm:$0xff]  ;;  %v2709_v36 = vld [vmem:[%s3080_s7 + $0x49] sm:$0xff]  ;;  %v5289_v1 = vld [vmem:[#allocation19_spill] sm:$0xff] }
 0x1d1   : > { %v5290_v0 = vld [vmem:[#allocation43_spill] sm:$0xff] }
 0x1d4   : > { %1255 = vrot.lane.b32.xlu2 %v5285_v45, %s2989_s14  ;;  %1243 = vrot.lane.b32.xlu1 %v5286_v30, %s2989_s14  ;;  %v5291_v45 = vld [vmem:[#allocation50_spill] sm:$0xff]  ;;  %v5292_v30 = vld [vmem:[#allocation51_spill] sm:$0xff] }
 0x1d5   : > { %1497 = vrot.lane.b32.xlu0 %v2740_v42, %s2990_s21  ;;  %v1601_v42 = vsel %vm1591_vm0, %v5290_v0, %v5289_v1  ;;  %v1623_v13 = vsel %vm1591_vm0, %v3631_v55, %v5292_v30  ;;  %v1655_v55 = vsel %vm1624_vm1, %v1622_v29, %v3637_v56 }
 0x1d6   : > { %v4002_v26 = vpop.permute.xlu2 %1123  ;;  %v4004_v23 = vpop.permute.xlu1 %1039  ;;  %v1634_v49 = vsel %vm1624_vm1, %v1601_v42, %v5291_v45  ;;  %v1656_v46 = vsel %vm1624_vm1, %v1623_v13, %v3689_v6  ;;  %v1688_v0 = vsel %vm1657_vm2, %v1655_v55, %v3807_v43  ;;  %v5295_v42 = vld [vmem:[#allocation9_spill] sm:$0xff]  ;;  %v5296_v45 = vld [vmem:[#allocation34_spill] sm:$0xff]  ;;  %v5297_v43 = vld [vmem:[#allocation56_spill] sm:$0xff] }
 0x1d7   : > { %v1038_v53 = vpop.permute.xlu0 %1037  ;;  %v5298_v13 = vld [vmem:[#allocation54_spill] sm:$0xff] }
 0x1d8   : > { %v4009_v16 = vsel %vm1690_vm3, %v1685_v60, %v1038_v53  ;;  %v1667_v60 = vsel %vm1657_vm2, %v1634_v49, %v3723_v20  ;;  %v1689_v53 = vsel %vm1657_vm2, %v1656_v46, %v3769_v31  ;;  %v2678_v31 = vld [vmem:[%s3080_s7 + $0x50] sm:$0xff]  ;;  %v1594_v49 = vsel %vm1591_vm0, %v5296_v45, %v5295_v42  ;;  %v5299_v42 = vld [vmem:[#allocation15_spill] sm:$0xff]  ;;  %v5300_v45 = vld [vmem:[#allocation44_spill] sm:$0xff] }
 0x1d9   : > { %v1627_v30 = vsel %vm1624_vm1, %v1594_v49, %v5297_v43  ;;  %v1599_v49 = vsel %vm1591_vm0, %v5300_v45, %v5299_v42  ;;  %v5301_v43 = vld [vmem:[#allocation69_spill] sm:$0xff]  ;;  %v5304_v42 = vld [vmem:[#allocation18_spill] sm:$0xff] }
 0x1da   : > { %v1660_v39 = vsel %vm1657_vm2, %v1627_v30, %v3701_v9  ;;  %v5305_v45 = vld [vmem:[#allocation49_spill] sm:$0xff] }
 0x1db   : > { %v1693_v22 = vsel %vm1690_vm3, %v1660_v39, %v3781_v34 }
 0x1dc   : > { %1499 = vrot.lane.b32.xlu2 %v2741_v19, %s2990_s21  ;;  %1383 = vrot.lane.b32.xlu1 %v2715_v54, %s2988_s13  ;;  %v1700_v19 = vsel %vm1690_vm3, %v1667_v60, %v3857_v57  ;;  %v2747_v57 = vld [vmem:[%s3080_s7 + $0x92] sm:$0xff] }
 0x1dd   : > { %1371 = vrot.lane.b32.xlu0 %v2709_v36, %s2988_s13 }
 0x1de   : > { %v1130_v54 = vpop.permute.xlu2 %1129  ;;  %v1046_v1 = vpop.permute.xlu1 %1045 }
 0x1df   : > { %v4041_v6 = vsel %vm1723_vm4, %v1700_v19, %v1130_v54  ;;  %v4044_v20 = vsel %vm1690_vm3, %v1689_v53, %v1046_v1  ;;  %v1044_v36 = vpop.permute.xlu0 %1043  ;;  %v2691_v53 = vld [vmem:[%s3080_s7 + $0xf0] sm:$0xff]  ;;  %v2716_v19 = vld [vmem:[%s3080_s7 + $0x99] sm:$0xff] }
 0x1e0   : > { %v4047_v56 = vsel %vm1690_vm3, %v1688_v0, %v1044_v36  ;;  %v2710_v54 = vld [vmem:[%s3080_s7 + $0x51] sm:$0xff] }
 0x1e1   : > { %v2723_v36 = vld [vmem:[%s3080_s7 + $0xf1] sm:$0xff] }
 0x1e4   : > { %1257 = vrot.lane.b32.xlu2 %v5298_v13, %s2989_s14  ;;  %1245 = vrot.lane.b32.xlu1 %v2678_v31, %s2989_s14  ;;  %v2748_v31 = vld [vmem:[%s3080_s7 + $0x9a] sm:$0xff] }
 0x1e5   : > { %1511 = vrot.lane.b32.xlu0 %v2747_v57, %s2990_s21  ;;  %v2742_v57 = vld [vmem:[%s3080_s7 + $0x52] sm:$0xff] }
 0x1e6   : > { %v4064_v29 = vpop.permute.xlu2 %1135  ;;  %v1116_v46 = vpop.permute.xlu1 %1115 }
 0x1e7   : > { %v4067_v60 = vsel %vm1723_vm4, %v1693_v22, %v1116_v46  ;;  %v4069_v55 = vpop.permute.xlu0 %1113 }
 0x1ec   : > { %1271 = vrot.lane.b32.xlu2 %v2691_v53, %s2989_s14  ;;  %1385 = vrot.lane.b32.xlu1 %v2716_v19, %s2988_s13 }
 0x1ed   : > { %1373 = vrot.lane.b32.xlu0 %v2710_v54, %s2988_s13  ;;  %v2685_v54 = vld [vmem:[%s3080_s7 + $0xa8] sm:$0xff] }
 0x1ee   : > { %v1142_v9 = vpop.permute.xlu2 %1141  ;;  %v4077_v34 = vpop.permute.xlu1 %1121 }
 0x1ef   : > { %v4081_v1 = vsel %vm1723_vm4, %v3897_v51, %v1142_v9  ;;  %v4083_v0 = vpop.permute.xlu0 %1119  ;;  %v1632_v51 = vsel %vm1624_vm1, %v1599_v49, %v5301_v43  ;;  %v2679_v9 = vld [vmem:[%s3080_s7 + $0x60] sm:$0xff]  ;;  %v5306_v49 = vld [vmem:[#allocation73_spill] sm:$0xff] }
 0x1f0   : > { %v1665_v30 = vsel %vm1657_vm2, %v1632_v51, %v3673_v7  ;;  %v5307_v43 = vld [vmem:[#allocation75_spill] sm:$0xff] }
 0x1f1   : > { %v1698_v22 = vsel %vm1690_vm3, %v1665_v30, %v3843_v59  ;;  %v1602_v59 = vsel %vm1591_vm0, %v5305_v45, %v5304_v42 }
 0x1f2   : > { %v1635_v51 = vsel %vm1624_vm1, %v1602_v59, %v5307_v43  ;;  %v2724_v59 = vld [vmem:[%s3080_s7 + $0xf9] sm:$0xff] }
 0x1f3   : > { %v5308_v43 = vld [vmem:[#allocation14_spill] sm:$0xff] }
 0x1f4   : > { %1399 = vrot.lane.b32.xlu2 %v2723_v36, %s2988_s13  ;;  %1513 = vrot.lane.b32.xlu1 %v2748_v31, %s2990_s21  ;;  %v2755_v36 = vld [vmem:[%s3080_s7 + $0xf2] sm:$0xff] }
 0x1f5   : > { %1501 = vrot.lane.b32.xlu0 %v2742_v57, %s2990_s21  ;;  %v5302_v31 = vld [vmem:[#allocation38_spill] sm:$0xff]  ;;  %v5303_v57 = vld [vmem:[#allocation65_spill] sm:$0xff] }
 0x1f6   : > { %v1148_v13 = vpop.permute.xlu2 %1147  ;;  %v4098_v39 = vpop.permute.xlu1 %1127  ;;  %v1613_v7 = vsel %vm1591_vm0, %v5303_v57, %v5302_v31 }
 0x1f7   : > { %v4104_v46 = vsel %vm1723_vm4, %v3928_v50, %v1148_v13  ;;  %v1126_v53 = vpop.permute.xlu0 %1125  ;;  %v1646_v50 = vsel %vm1624_vm1, %v1613_v7, %v5306_v49  ;;  %v1668_v13 = vsel %vm1657_vm2, %v1635_v51, %v3685_v10  ;;  %v2717_v10 = vld [vmem:[%s3080_s7 + $0xa9] sm:$0xff]  ;;  %v2711_v7 = vld [vmem:[%s3080_s7 + $0x61] sm:$0xff] }
 0x1f8   : > { %v4107_v19 = vsel %vm1723_vm4, %v1698_v22, %v1126_v53  ;;  %v1679_v30 = vsel %vm1657_vm2, %v1646_v50, %v3771_v32  ;;  %v2749_v49 = vld [vmem:[%s3080_s7 + $0xaa] sm:$0xff]  ;;  %v2743_v50 = vld [vmem:[%s3080_s7 + $0x62] sm:$0xff] }
 0x1f9   : > { %v1712_v22 = vsel %vm1690_vm3, %v1679_v30, %v3951_v52  ;;  %v5310_v30 = vld [vmem:[#allocation85_spill] sm:$0xff] }
 0x1fc   : > { %1259 = vrot.lane.b32.xlu2 %v2685_v54, %s2989_s14  ;;  %1247 = vrot.lane.b32.xlu1 %v2679_v9, %s2989_s14  ;;  %v1701_v9 = vsel %vm1690_vm3, %v1668_v13, %v3855_v5 }
 0x1fd   : > { %1527 = vrot.lane.b32.xlu0 %v2755_v36, %s2990_s21 }
 0x1fe   : > { %v1154_v53 = vpop.permute.xlu2 %1153  ;;  %v4131_v54 = vpop.permute.xlu1 %1133 }
 0x1ff   : > { %v4136_v31 = vsel %vm1723_vm4, %v1712_v22, %v1154_v53  ;;  %v1132_v32 = vpop.permute.xlu0 %1131 }
 0x200   : > { %v4139_v36 = vsel %vm1723_vm4, %v1701_v9, %v1132_v32 }
 0x204   : > { %1273 = vrot.lane.b32.xlu2 %v5303_v57, %s2989_s14  ;;  %1387 = vrot.lane.b32.xlu1 %v2717_v10, %s2988_s13  ;;  %v5309_v57 = vld [vmem:[#allocation58_spill] sm:$0xff] }
 0x205   : > { %1375 = vrot.lane.b32.xlu0 %v2711_v7, %s2988_s13  ;;  %v1609_v51 = vsel %vm1591_vm0, %v5309_v57, %v5308_v43  ;;  %v5312_v43 = vld [vmem:[#allocation64_spill] sm:$0xff] }
 0x206   : > { %v1160_v52 = vpop.permute.xlu2 %1159  ;;  %v4147_v42 = vpop.permute.xlu1 %1139  ;;  %v1642_v13 = vsel %vm1624_vm1, %v1609_v51, %v5310_v30 }
 0x207   : > { %v4151_v5 = vsel %vm1723_vm4, %v3989_v25, %v1160_v52  ;;  %v4153_v45 = vpop.permute.xlu0 %1137  ;;  %v1675_v25 = vsel %vm1657_vm2, %v1642_v13, %v3761_v24  ;;  %v2686_v24 = vld [vmem:[%s3080_s7 + $0xb0] sm:$0xff] }
 0x208   : > { %v1708_v22 = vsel %vm1690_vm3, %v1675_v25, %v3841_v58 }
 0x20c   : > { %1401 = vrot.lane.b32.xlu2 %v2724_v59, %s2988_s13  ;;  %1515 = vrot.lane.b32.xlu1 %v2749_v49, %s2990_s21  ;;  %v2680_v59 = vld [vmem:[%s3080_s7 + $0x68] sm:$0xff]  ;;  %v2756_v49 = vld [vmem:[%s3080_s7 + $0xfa] sm:$0xff] }
 0x20d   : > { %1503 = vrot.lane.b32.xlu0 %v2743_v50, %s2990_s21  ;;  %v5311_v50 = vld [vmem:[#allocation17_spill] sm:$0xff] }
 0x20e   : > { %v1166_v53 = vpop.permute.xlu2 %1165  ;;  %v1146_v9 = vpop.permute.xlu1 %1145  ;;  %v1612_v58 = vsel %vm1591_vm0, %v5312_v43, %v5311_v50  ;;  %v1856_v43 = vld [vmem:[%s5123_s1 + $0x8] sm:$0xff] }
 0x20f   : > { %v4172_v32 = vsel %vm1723_vm4, %v4009_v16, %v1166_v53  ;;  %v4175_v10 = vsel %vm1723_vm4, %v1708_v22, %v1146_v9  ;;  %v1144_v7 = vpop.permute.xlu0 %1143  ;;  %v1645_v57 = vsel %vm1624_vm1, %v1612_v58, %v3639_v44  ;;  %v2718_v53 = vld [vmem:[%s3080_s7 + $0xb1] sm:$0xff]  ;;  %v2712_v9 = vld [vmem:[%s3080_s7 + $0x69] sm:$0xff] }
 0x210   : > { %v4179_v52 = vsel %vm1723_vm4, %v3894_v62, %v1144_v7  ;;  %v1678_v62 = vsel %vm1657_vm2, %v1645_v57, %v3773_v27  ;;  %v1859_v27 = vld [vmem:[%s5123_s1 + $0x20] sm:$0xf]  ;;  %v5313_v7 = vld [vmem:[#allocation20_spill] sm:$0xff] }
 0x211   : > { %v1711_v16 = vsel %vm1690_vm3, %v1678_v62, %v3853_v2  ;;  %2771 = vmatpush.msk.msra.mxu0 %vm1957_vm5, %v1859_v27  ;;  %v1858_v2 = vld [vmem:[%s5123_s1 + $0x18] sm:$0xff]  ;;  %2810 = vmatpush.msk.msra.mxu1 %vm1957_vm5, %v1859_v27 }
 0x212   : > { %2811 = vmatpush.msk.msra.mxu2 %vm1957_vm5, %v1859_v27  ;;  %2812 = vmatpush.msk.msra.mxu3 %vm1957_vm5, %v1859_v27  ;;  %v5316_v27 = vld [vmem:[#allocation76_spill] sm:$0xff] }
 0x213   : > { %1973 = vmatpush.msra.mxu0 %v1858_v2  ;;  %2813 = vmatpush.msra.mxu1 %v1858_v2 }
 0x214   : > { %1261 = vrot.lane.b32.xlu2 %v2686_v24, %s2989_s14  ;;  %1249 = vrot.lane.b32.xlu1 %v2680_v59, %s2989_s14  ;;  %v5314_v24 = vld [vmem:[#allocation70_spill] sm:$0xff] }
 0x215   : > { %1529 = vrot.lane.b32.xlu0 %v2756_v49, %s2990_s21  ;;  %v1615_v59 = vsel %vm1591_vm0, %v5314_v24, %v5313_v7  ;;  %2814 = vmatpush.msra.mxu2 %v1858_v2 }
 0x216   : > { %v1172_v51 = vpop.permute.xlu2 %1171  ;;  %v1152_v30 = vpop.permute.xlu1 %1151  ;;  %2815 = vmatpush.msra.mxu3 %v1858_v2  ;;  %v1648_v49 = vsel %vm1624_vm1, %v1615_v59, %v3651_v35 }
 0x217   : > { %v4198_v44 = vsel %vm1723_vm4, %v4047_v56, %v1172_v51  ;;  %v4201_v13 = vsel %vm1723_vm4, %v1711_v16, %v1152_v30  ;;  %v1150_v25 = vpop.permute.xlu0 %1149  ;;  %v2693_v56 = vld [vmem:[%s3080_s7 + $0x108] sm:$0xff]  ;;  %v1681_v50 = vsel %vm1657_vm2, %v1648_v49, %v3785_v17  ;;  %v1855_v16 = vld [vmem:[%s5123_s1] sm:$0xff] }
 0x218   : > { %v4208_v22 = vsel %vm1723_vm4, %v3925_v48, %v1150_v25  ;;  %v1857_v48 = vld [vmem:[%s5123_s1 + $0x10] sm:$0xff]  ;;  %v1714_v58 = vsel %vm1690_vm3, %v1681_v50, %v3865_v40  ;;  %v5315_v25 = vld [vmem:[#allocation24_spill] sm:$0xff] }
 0x219   : > { %1974 = vmatpush.msra.mxu0 %v1857_v48  ;;  %2816 = vmatpush.msra.mxu1 %v1857_v48  ;;  %v2750_v40 = vld [vmem:[%s3080_s7 + $0xb2] sm:$0xff]  ;;  %v2744_v30 = vld [vmem:[%s3080_s7 + $0x6a] sm:$0xff]  ;;  %v1618_v2 = vsel %vm1591_vm0, %v5316_v27, %v5315_v25 }
 0x21a   : > { %2817 = vmatpush.msra.mxu2 %v1857_v48  ;;  %2818 = vmatpush.msra.mxu3 %v1857_v48  ;;  %v2757_v49 = vld [vmem:[%s3080_s7 + $0x10a] sm:$0xff] }
 0x21b   : > { %1975 = vmatpush.msra.mxu0 %v1856_v43  ;;  %2819 = vmatpush.msra.mxu1 %v1856_v43  ;;  %v2731_v50 = vld [vmem:[%s3080_s7 + $0x151] sm:$0xff] }
 0x21c   : > { %1275 = vrot.lane.b32.xlu2 %v2693_v56, %s2989_s14  ;;  %1389 = vrot.lane.b32.xlu1 %v2718_v53, %s2988_s13  ;;  %v5317_v53 = vld [vmem:[#allocation84_spill] sm:$0xff] }
 0x21d   : > { %1377 = vrot.lane.b32.xlu0 %v2712_v9, %s2988_s13  ;;  %2820 = vmatpush.msra.mxu2 %v1856_v43 }
 0x21e   : > { %v4238_v35 = vpop.permute.xlu2 %1367  ;;  %v1158_v57 = vpop.permute.xlu1 %1157  ;;  %1976 = vmatpush.msra.mxu0 %v1855_v16  ;;  %2821 = vmatpush.msra.mxu3 %v1856_v43  ;;  %v5318_v43 = vld [vmem:[#allocation30_spill] sm:$0xff] }
 0x21f   : > { %v4241_v62 = vsel %vm1723_vm4, %v1714_v58, %v1158_v57  ;;  %v1156_v17 = vpop.permute.xlu0 %1155  ;;  %2822 = vmatpush.msra.mxu1 %v1855_v16  ;;  %2823 = vmatpush.msra.mxu2 %v1855_v16  ;;  %v5319_v58 = vld [vmem:[#allocation82_spill] sm:$0xff] }
 0x220   : > { %v4248_v51 = vsel %vm1723_vm4, %v3949_v21, %v1156_v17  ;;  %2824 = vmatpush.msra.mxu3 %v1855_v16  ;;  %v1651_v21 = vsel %vm1624_vm1, %v1618_v2, %v3663_v4  ;;  %v1621_v57 = vsel %vm1591_vm0, %v5319_v58, %v5318_v43  ;;  %v5320_v17 = vld [vmem:[#allocation46_spill] sm:$0xff] }
 0x221   : > { %v1684_v56 = vsel %vm1657_vm2, %v1651_v21, %v3797_v33  ;;  %v2725_v33 = vld [vmem:[%s3080_s7 + $0x109] sm:$0xff]  ;;  %v1654_v16 = vsel %vm1624_vm1, %v1621_v57, %v3675_v8 }
 0x222   : > { %v1717_v9 = vsel %vm1690_vm3, %v1684_v56, %v3889_v12  ;;  %v1620_v12 = vsel %vm1591_vm0, %v5317_v53, %v5320_v17  ;;  %v2687_v56 = vld [vmem:[%s3080_s7 + $0xc0] sm:$0xff]  ;;  %v2694_v57 = vld [vmem:[%s3080_s7 + $0x110] sm:$0xff] }
 0x223   : > { %v2719_v17 = vld [vmem:[%s3080_s7 + $0xc1] sm:$0xff] }
 0x224   : > { %1517 = vrot.lane.b32.xlu2 %v2750_v40, %s2990_s21  ;;  %1505 = vrot.lane.b32.xlu1 %v2744_v30, %s2990_s21  ;;  %v1687_v40 = vsel %vm1657_vm2, %v1654_v16, %v3809_v37  ;;  %v2713_v16 = vld [vmem:[%s3080_s7 + $0x79] sm:$0xff] }
 0x225   : > { %1287 = vrot.lane.b32.xlu0 %v5317_v53, %s2989_s14  ;;  %v1720_v8 = vsel %vm1690_vm3, %v1687_v40, %v3920_v63  ;;  %v2763_v53 = vld [vmem:[%s3080_s7 + $0x152] sm:$0xff]  ;;  %v277_v63 = vld [vmem:[%s3080_s7] sm:$0xff]  ;;  %v278_v40 = vld [vmem:[%s3080_s7 + $0x8] sm:$0xff] }
 0x226   : > { %v4265_v48 = vpop.permute.xlu2 %1369  ;;  %v1164_v7 = vpop.permute.xlu1 %1163 }
 0x227   : > { %v4268_v24 = vsel %vm1723_vm4, %v1717_v9, %v1164_v7  ;;  %v1162_v4 = vpop.permute.xlu0 %1161  ;;  %v5321_v7 = vld [vmem:[#allocation10_spill] sm:$0xff] }
 0x228   : > { %v4272_v59 = vsel %vm1723_vm4, %v3986_v18, %v1162_v4  ;;  %v1653_v18 = vsel %vm1624_vm1, %v1620_v12, %v3677_v3  ;;  %v1592_v4 = vsel %vm1591_vm0, %v277_v63, %v5321_v7  ;;  %v2745_v63 = vld [vmem:[%s3080_s7 + $0x7a] sm:$0xff] }
 0x229   : > { %v1686_v30 = vsel %vm1657_vm2, %v1653_v18, %v3757_v28  ;;  %v2681_v28 = vld [vmem:[%s3080_s7 + $0x78] sm:$0xff] }
 0x22a   : > { %v1719_v2 = vsel %vm1690_vm3, %v1686_v30, %v4004_v23  ;;  %v2700_v7 = vld [vmem:[%s3080_s7 + $0x158] sm:$0xff] }
 0x22c   : > { %1531 = vrot.lane.b32.xlu2 %v2757_v49, %s2990_s21  ;;  %1415 = vrot.lane.b32.xlu1 %v2731_v50, %s2988_s13  ;;  %v5322_v50 = vld [vmem:[#allocation36_spill] sm:$0xff] }
 0x22d   : > { %1403 = vrot.lane.b32.xlu0 %v2725_v33, %s2988_s13  ;;  %v1625_v33 = vsel %vm1624_vm1, %v1592_v4, %v5322_v50 }
 0x22e   : > { %v4296_v25 = vpop.permute.xlu2 %1255  ;;  %v1170_v27 = vpop.permute.xlu1 %1169  ;;  %v1658_v58 = vsel %vm1657_vm2, %v1625_v33, %v3687_v11 }
 0x22f   : > { %v4301_v21 = vsel %vm1723_vm4, %v1720_v8, %v1170_v27  ;;  %v1168_v3 = vpop.permute.xlu0 %1167  ;;  %v1691_v12 = vsel %vm1690_vm3, %v1658_v58, %v3821_v41  ;;  %v2732_v58 = vld [vmem:[%s3080_s7 + $0x159] sm:$0xff] }
 0x230   : > { %v4304_v37 = vsel %vm1723_vm4, %v1719_v2, %v1168_v3  ;;  %v1724_v18 = vsel %vm1723_vm4, %v1691_v12, %v3946_v38  ;;  %v5323_v38 = vld [vmem:[#allocation13_spill] sm:$0xff] }
 0x231   : > { %v5324_v2 = vld [vmem:[#allocation57_spill] sm:$0xff] }
 0x234   : > { %1263 = vrot.lane.b32.xlu2 %v2687_v56, %s2989_s14  ;;  %1251 = vrot.lane.b32.xlu1 %v2681_v28, %s2989_s14 }
 0x235   : > { %1543 = vrot.lane.b32.xlu0 %v2763_v53, %s2990_s21  ;;  %v2751_v53 = vld [vmem:[%s3080_s7 + $0xc2] sm:$0xff] }
 0x236   : > { %v1500_v23 = vpop.permute.xlu2 %1499  ;;  %v1240_v9 = vpop.permute.xlu1 %1239 }
 0x237   : > { %v1174_v49 = vpop.permute.xlu0 %1173  ;;  %v1757_v30 = vsel %vm1756_vm6, %v1724_v18, %v1240_v9 }
 0x238   : > { %v4319_v43 = vsel %vm1723_vm4, %v4044_v20, %v1174_v49  ;;  %v1593_v20 = vsel %vm1591_vm0, %v278_v40, %v5323_v38  ;;  %v1790_v27 = vsel %vm1789_vm7, %v1757_v30, %v4238_v35  ;;  %v2894_v40 = vld [vmem:[%s3080_s7 + $0x60] sm:$0xff] }
 0x239   : > { %v1626_v3 = vsel %vm1624_vm1, %v1593_v20, %v5324_v2  ;;  %v5325_v30 = vld [vmem:[#allocation7_spill] sm:$0xff]  ;;  %v2688_v20 = vld [vmem:[%s3080_s7 + $0xc8] sm:$0xff] }
 0x23a   : > { %v1659_v28 = vsel %vm1657_vm2, %v1626_v3, %v3649_v61  ;;  %v2764_v3 = vld [vmem:[%s3080_s7 + $0x15a] sm:$0xff] }
 0x23b   : > { %v1692_v9 = vsel %vm1690_vm3, %v1659_v28, %v3819_v47 }
 0x23c   : > { %1277 = vrot.lane.b32.xlu2 %v2694_v57, %s2989_s14  ;;  %1391 = vrot.lane.b32.xlu1 %v2719_v17, %s2988_s13  ;;  %v1725_v35 = vsel %vm1723_vm4, %v1692_v9, %v4069_v55  ;;  %v2758_v55 = vld [vmem:[%s3080_s7 + $0x112] sm:$0xff] }
 0x23d   : > { %1379 = vrot.lane.b32.xlu0 %v2713_v16, %s2988_s13  ;;  %v2726_v57 = vld [vmem:[%s3080_s7 + $0x111] sm:$0xff] }
 0x23e   : > { %v4335_v11 = vpop.permute.xlu2 %1257  ;;  %v1242_v41 = vpop.permute.xlu1 %1241 }
 0x23f   : > { %v1496_v8 = vpop.permute.xlu0 %1495  ;;  %v1758_v4 = vsel %vm1756_vm6, %v1725_v35, %v1242_v41  ;;  %v1600_v41 = vsel %vm1591_vm0, %v2894_v40, %v5325_v30 }
 0x240   : > { %v1823_v56 = vsel %vm1822_vm8, %v1790_v27, %v1496_v8  ;;  %v1791_v47 = vsel %vm1789_vm7, %v1758_v4, %v4265_v48  ;;  %v2682_v8 = vld [vmem:[%s3080_s7 + $0x80] sm:$0xff]  ;;  %v5326_v27 = vld [vmem:[#allocation68_spill] sm:$0xff] }
 0x241   : > { %2772 = vmatmul.msk.f32.vlgmr.msra.gmra.mxu0 %vm1860_vm9, %v1823_v56  ;;  %v1633_v2 = vsel %vm1624_vm1, %v1600_v41, %v5326_v27  ;;  %v5327_v56 = vld [vmem:[#allocation94_spill] sm:$0xff]  ;;  %v2695_v4 = vld [vmem:[%s3080_s7 + $0x120] sm:$0xff] }
 0x244   : > { %1519 = vrot.lane.b32.xlu2 %v2751_v53, %s2990_s21  ;;  %1507 = vrot.lane.b32.xlu1 %v2745_v63, %s2990_s21 }
 0x245   : > { %1289 = vrot.lane.b32.xlu0 %v2700_v7, %s2989_s14 }
 0x246   : > { %v4358_v61 = vpop.permute.xlu2 %1271  ;;  %v1244_v49 = vpop.permute.xlu1 %1243 }
 0x247   : > { %v1498_v50 = vpop.permute.xlu0 %1497  ;;  %v1759_v48 = vsel %vm1756_vm6, %v4067_v60, %v1244_v49  ;;  %v1666_v60 = vsel %vm1657_vm2, %v1633_v2, %v3725_v15  ;;  %v2714_v49 = vld [vmem:[%s3080_s7 + $0x81] sm:$0xff] }
 0x248   : > { %v1824_v33 = vsel %vm1822_vm8, %v1791_v47, %v1498_v50  ;;  %v1699_v28 = vsel %vm1690_vm3, %v1666_v60, %v5327_v56  ;;  %v2721_v56 = vld [vmem:[%s3080_s7 + $0xd9] sm:$0xff] }
 0x249   : > { %2773 = vmatmul.msk.f32.gmra.mxu0 %vm1860_vm9, %v1824_v33  ;;  %v2752_v33 = vld [vmem:[%s3080_s7 + $0xca] sm:$0xff] }
 0x24c   : > { %1533 = vrot.lane.b32.xlu2 %v2758_v55, %s2990_s21  ;;  %1417 = vrot.lane.b32.xlu1 %v2732_v58, %s2988_s13  ;;  %v2746_v55 = vld [vmem:[%s3080_s7 + $0x82] sm:$0xff] }
 0x24d   : > { %1405 = vrot.lane.b32.xlu0 %v2726_v57, %s2988_s13  ;;  %v2701_v58 = vld [vmem:[%s3080_s7 + $0x168] sm:$0xff]  ;;  %v1766_v57 = vsel %vm1756_vm6, %v4041_v6, %v4335_v11 }
 0x24e   : > { %v1400_v17 = vpop.permute.xlu2 %1399  ;;  %v1384_v12 = vpop.permute.xlu1 %1383  ;;  %v2733_v6 = vld [vmem:[%s3080_s7 + $0x169] sm:$0xff]  ;;  %v2727_v11 = vld [vmem:[%s3080_s7 + $0x121] sm:$0xff] }
 0x24f   : > { %v1372_v16 = vpop.permute.xlu0 %1371 }
 0x250   : > { %v1792_v18 = vsel %vm1789_vm7, %v1759_v48, %v1372_v16 }
 0x251   : > { %v1825_v38 = vsel %vm1822_vm8, %v1792_v18, %v1500_v23  ;;  %v1732_v23 = vsel %vm1723_vm4, %v1699_v28, %v4098_v39  ;;  %v2720_v39 = vld [vmem:[%s3080_s7 + $0xc9] sm:$0xff]  ;;  %v2689_v28 = vld [vmem:[%s3080_s7 + $0xd8] sm:$0xff] }
 0x252   : > { %2774 = vmatmul.msk.f32.gmra.mxu0 %vm1860_vm9, %v1825_v38  ;;  %v1765_v53 = vsel %vm1756_vm6, %v1732_v23, %v4296_v25  ;;  %v2765_v23 = vld [vmem:[%s3080_s7 + $0x16a] sm:$0xff] }
 0x253   : > { %v1798_v9 = vsel %vm1789_vm7, %v1765_v53, %v1384_v12  ;;  %v2895_v53 = vld [vmem:[%s3080_s7 + $0x30] sm:$0xff] }
 0x254   : > { %1265 = vrot.lane.b32.xlu2 %v2688_v20, %s2989_s14  ;;  %1253 = vrot.lane.b32.xlu1 %v2682_v8, %s2989_s14  ;;  %v1773_v20 = vsel %vm1756_vm6, %v4179_v52, %v4358_v61 }
 0x255   : > { %1545 = vrot.lane.b32.xlu0 %v2764_v3, %s2990_s21  ;;  %v1806_v2 = vsel %vm1789_vm7, %v1773_v20, %v1400_v17 }
 0x256   : > { %v4394_v63 = vpop.permute.xlu2 %1259  ;;  %v1246_v15 = vpop.permute.xlu1 %1245 }
 0x257   : > { %v1512_v7 = vpop.permute.xlu0 %1511  ;;  %v1760_v12 = vsel %vm1756_vm6, %v3983_v14, %v1246_v15  ;;  %v2759_v14 = vld [vmem:[%s3080_s7 + $0x122] sm:$0xff]  ;;  %v5328_v15 = vld [vmem:[#allocation5_spill] sm:$0xff] }
 0x258   : > { %v1831_v35 = vsel %vm1822_vm8, %v1798_v9, %v1512_v7  ;;  %v1596_v9 = vsel %vm1591_vm0, %v2895_v53, %v5328_v15  ;;  %v2753_v7 = vld [vmem:[%s3080_s7 + $0xda] sm:$0xff] }
 0x259   : > { %2780 = vmatmul.msk.f32.vlgmr.msra.gmra.mxu1 %vm1860_vm9, %v1831_v35  ;;  %v2702_v35 = vld [vmem:[%s3080_s7 + $0x170] sm:$0xff]  ;;  %v5334_v53 = vld [vmem:[#allocation91_spill] sm:$0xff] }
 0x25c   : > { %1279 = vrot.lane.b32.xlu2 %v2695_v4, %s2989_s14  ;;  %1393 = vrot.lane.b32.xlu1 %v2720_v39, %s2988_s13  ;;  %v5329_v4 = vld [vmem:[#allocation63_spill] sm:$0xff] }
 0x25d   : > { %1381 = vrot.lane.b32.xlu0 %v2714_v49, %s2988_s13  ;;  %v1629_v39 = vsel %vm1624_vm1, %v1596_v9, %v5329_v4  ;;  %v2696_v49 = vld [vmem:[%s3080_s7 + $0x128] sm:$0xff] }
 0x25e   : > { %v4405_v25 = vpop.permute.xlu2 %1273  ;;  %v1386_v50 = vpop.permute.xlu1 %1385 }
 0x25f   : > { %v1374_v47 = vpop.permute.xlu0 %1373  ;;  %v1799_v48 = vsel %vm1789_vm7, %v1766_v57, %v1386_v50  ;;  %v5330_v50 = vld [vmem:[#allocation86_spill] sm:$0xff]  ;;  %v1767_v57 = vsel %vm1756_vm6, %v4139_v36, %v4394_v63  ;;  %v2760_v36 = vld [vmem:[%s3080_s7 + $0x12a] sm:$0xff] }
 0x260   : > { %v1793_v40 = vsel %vm1789_vm7, %v1760_v12, %v1374_v47  ;;  %v1662_v47 = vsel %vm1657_vm2, %v1629_v39, %v5330_v50  ;;  %v2734_v63 = vld [vmem:[%s3080_s7 + $0x171] sm:$0xff] }
 0x264   : > { %1521 = vrot.lane.b32.xlu2 %v2752_v33, %s2990_s21  ;;  %1509 = vrot.lane.b32.xlu1 %v2746_v55, %s2990_s21  ;;  %v5331_v33 = vld [vmem:[#allocation97_spill] sm:$0xff] }
 0x265   : > { %1291 = vrot.lane.b32.xlu0 %v2701_v58, %s2989_s14  ;;  %v1695_v55 = vsel %vm1690_vm3, %v1662_v47, %v5331_v33  ;;  %v2897_v47 = vld [vmem:[%s3080_s7 + $0x38] sm:$0xff] }
 0x266   : > { %v4419_v16 = vpop.permute.xlu2 %1401  ;;  %v1514_v18 = vpop.permute.xlu1 %1513  ;;  %v1728_v58 = vsel %vm1723_vm4, %v1695_v55, %v4083_v0  ;;  %v5336_v33 = vld [vmem:[#allocation6_spill] sm:$0xff] }
 0x267   : > { %v1502_v30 = vpop.permute.xlu0 %1501  ;;  %v1832_v41 = vsel %vm1822_vm8, %v1799_v48, %v1514_v18  ;;  %v1597_v55 = vsel %vm1591_vm0, %v2897_v47, %v5336_v33  ;;  %v5343_v33 = vld [vmem:[#allocation90_spill] sm:$0xff] }
 0x268   : > { %v1826_v38 = vsel %vm1822_vm8, %v1793_v40, %v1502_v30  ;;  %2781 = vmatmul.msk.f32.gmra.mxu1 %vm1860_vm9, %v1832_v41 }
 0x269   : > { %2775 = vmatmul.msk.f32.gmra.mxu0 %vm1860_vm9, %v1826_v38 }
 0x26c   : > { %1535 = vrot.lane.b32.xlu2 %v2759_v14, %s2990_s21  ;;  %1419 = vrot.lane.b32.xlu1 %v2733_v6, %s2988_s13  ;;  %v2728_v14 = vld [vmem:[%s3080_s7 + $0x129] sm:$0xff]  ;;  %v1774_v6 = vsel %vm1756_vm6, %v4175_v10, %v4405_v25  ;;  %v2766_v25 = vld [vmem:[%s3080_s7 + $0x172] sm:$0xff] }
 0x26d   : > { %1407 = vrot.lane.b32.xlu0 %v2727_v11, %s2988_s13 }
 0x26e   : > { %v4435_v8 = vpop.permute.xlu2 %1261  ;;  %v1248_v27 = vpop.permute.xlu1 %1247 }
 0x26f   : > { %v1528_v3 = vpop.permute.xlu0 %1527  ;;  %v1761_v12 = vsel %vm1756_vm6, %v1728_v58, %v1248_v27  ;;  %v1807_v27 = vsel %vm1789_vm7, %v1774_v6, %v4419_v16  ;;  %v5335_v16 = vld [vmem:[#allocation95_spill] sm:$0xff] }
 0x270   : > { %v1839_v60 = vsel %vm1822_vm8, %v1806_v2, %v1528_v3 }
 0x271   : > { %2788 = vmatmul.msk.f32.vlgmr.msra.gmra.mxu2 %vm1860_vm9, %v1839_v60  ;;  %v2896_v60 = vld [vmem:[%s3080_s7 + $0x80] sm:$0xff] }
 0x274   : > { %1395 = vrot.lane.b32.xlu2 %v2721_v56, %s2988_s13  ;;  %1267 = vrot.lane.b32.xlu1 %v2689_v28, %s2989_s14  ;;  %v5332_v56 = vld [vmem:[#allocation8_spill] sm:$0xff] }
 0x275   : > { %1547 = vrot.lane.b32.xlu0 %v2765_v23, %s2990_s21  ;;  %v1603_v28 = vsel %vm1591_vm0, %v2896_v60, %v5332_v56  ;;  %v2722_v23 = vld [vmem:[%s3080_s7 + $0xe1] sm:$0xff] }
 0x276   : > { %v4446_v52 = vpop.permute.xlu2 %1275  ;;  %v1388_v61 = vpop.permute.xlu1 %1387 }
 0x277   : > { %v1376_v17 = vpop.permute.xlu0 %1375  ;;  %v1800_v48 = vsel %vm1789_vm7, %v1767_v57, %v1388_v61  ;;  %v2690_v61 = vld [vmem:[%s3080_s7 + $0xe0] sm:$0xff]  ;;  %v5337_v57 = vld [vmem:[#allocation62_spill] sm:$0xff]  ;;  %v1775_v56 = vsel %vm1756_vm6, %v4104_v46, %v4446_v52 }
 0x278   : > { %v1794_v30 = vsel %vm1789_vm7, %v1761_v12, %v1376_v17  ;;  %v5333_v17 = vld [vmem:[#allocation74_spill] sm:$0xff]  ;;  %v2754_v12 = vld [vmem:[%s3080_s7 + $0xe2] sm:$0xff] }
 0x279   : > { %v1636_v10 = vsel %vm1624_vm1, %v1603_v28, %v5333_v17  ;;  %v2704_v17 = vld [vmem:[%s3080_s7 + $0x188] sm:$0xff] }
 0x27a   : > { %v1669_v15 = vsel %vm1657_vm2, %v1636_v10, %v5334_v53  ;;  %v2698_v10 = vld [vmem:[%s3080_s7 + $0x140] sm:$0xff] }
 0x27b   : > { %v1702_v9 = vsel %vm1690_vm3, %v1669_v15, %v5335_v16 }
 0x27c   : > { %1523 = vrot.lane.b32.xlu2 %v2753_v7, %s2990_s21  ;;  %1293 = vrot.lane.b32.xlu1 %v2702_v35, %s2989_s14  ;;  %v1735_v7 = vsel %vm1723_vm4, %v1702_v9, %v4131_v54  ;;  %v1630_v54 = vsel %vm1624_vm1, %v1597_v55, %v5337_v57  ;;  %v2899_v9 = vld [vmem:[%s3080_s7 + $0x90] sm:$0xff] }
 0x27d   : > { %1281 = vrot.lane.b32.xlu0 %v2696_v49, %s2989_s14  ;;  %v1768_v35 = vsel %vm1756_vm6, %v1735_v7, %v4435_v8  ;;  %v2703_v8 = vld [vmem:[%s3080_s7 + $0x180] sm:$0xff]  ;;  %v5341_v7 = vld [vmem:[#allocation22_spill] sm:$0xff] }
 0x27e   : > { %v1518_v18 = vpop.permute.xlu2 %1517  ;;  %v1516_v40 = vpop.permute.xlu1 %1515 }
 0x27f   : > { %v1504_v41 = vpop.permute.xlu0 %1503  ;;  %v1833_v38 = vsel %vm1822_vm8, %v1800_v48, %v1516_v40  ;;  %v5338_v48 = vld [vmem:[#allocation89_spill] sm:$0xff] }
 0x280   : > { %v1827_v0 = vsel %vm1822_vm8, %v1794_v30, %v1504_v41  ;;  %2782 = vmatmul.msk.f32.gmra.mxu1 %vm1860_vm9, %v1833_v38  ;;  %v1663_v40 = vsel %vm1657_vm2, %v1630_v54, %v5338_v48  ;;  %v2697_v30 = vld [vmem:[%s3080_s7 + $0x138] sm:$0xff]  ;;  %v5339_v41 = vld [vmem:[#allocation93_spill] sm:$0xff] }
 0x281   : > { %2776 = vmatmul.msk.f32.gmra.mxu0 %vm1860_vm9, %v1827_v0  ;;  %v1696_v38 = vsel %vm1690_vm3, %v1663_v40, %v5339_v41  ;;  %v5345_v41 = vld [vmem:[#allocation16_spill] sm:$0xff] }
 0x284   : > { %1537 = vrot.lane.b32.xlu2 %v2760_v36, %s2990_s21  ;;  %1421 = vrot.lane.b32.xlu1 %v2734_v63, %s2988_s13 }
 0x285   : > { %1409 = vrot.lane.b32.xlu0 %v2728_v14, %s2988_s13 }
 0x286   : > { %v1532_v11 = vpop.permute.xlu2 %1531  ;;  %v1250_v20 = vpop.permute.xlu1 %1249 }
 0x287   : > { %v1530_v2 = vpop.permute.xlu0 %1529 }
 0x288   : > { %v1840_v3 = vsel %vm1822_vm8, %v1807_v27, %v1530_v2  ;;  %v2729_v2 = vld [vmem:[%s3080_s7 + $0x139] sm:$0xff] }
 0x289   : > { %2789 = vmatmul.msk.f32.gmra.mxu2 %vm1860_vm9, %v1840_v3  ;;  %v2898_v3 = vld [vmem:[%s3080_s7 + $0x181] sm:$0xff] }
 0x28c   : > { %1397 = vrot.lane.b32.xlu2 %v2722_v23, %s2988_s13  ;;  %1269 = vrot.lane.b32.xlu1 %v2690_v61, %s2989_s14 }
 0x28d   : > { %1549 = vrot.lane.b32.xlu0 %v2766_v25, %s2990_s21  ;;  %v5340_v25 = vld [vmem:[#allocation25_spill] sm:$0xff] }
 0x28e   : > { %v4507_v4 = vpop.permute.xlu2 %1263  ;;  %v1390_v39 = vpop.permute.xlu1 %1389 }
 0x28f   : > { %v1801_v49 = vsel %vm1789_vm7, %v1768_v35, %v1390_v39  ;;  %v1378_v50 = vpop.permute.xlu0 %1377  ;;  %v1604_v35 = vsel %vm1591_vm0, %v2899_v9, %v5341_v7  ;;  %v2736_v39 = vld [vmem:[%s3080_s7 + $0x189] sm:$0xff] }
 0x290   : > { %v1834_v58 = vsel %vm1822_vm8, %v1801_v49, %v1518_v18  ;;  %v1729_v18 = vsel %vm1723_vm4, %v1696_v38, %v4077_v34  ;;  %v2761_v34 = vld [vmem:[%s3080_s7 + $0x13a] sm:$0xff]  ;;  %v2762_v49 = vld [vmem:[%s3080_s7 + $0x142] sm:$0xff] }
 0x291   : > { %2783 = vmatmul.msk.f32.gmra.mxu1 %vm1860_vm9, %v1834_v58  ;;  %v1762_v0 = vsel %vm1756_vm6, %v1729_v18, %v1250_v20  ;;  %v5344_v58 = vld [vmem:[#allocation100_spill] sm:$0xff] }
 0x292   : > { %v1795_v36 = vsel %vm1789_vm7, %v1762_v0, %v1378_v50  ;;  %v5342_v50 = vld [vmem:[#allocation55_spill] sm:$0xff] }
 0x293   : > { %v1637_v47 = vsel %vm1624_vm1, %v1604_v35, %v5342_v50  ;;  %v2770_v9 = vld [vmem:[%s3080_s7 + $0x1a2] sm:$0xff] }
 0x294   : > { %1525 = vrot.lane.b32.xlu2 %v2754_v12, %s2990_s21  ;;  %1295 = vrot.lane.b32.xlu1 %v2703_v8, %s2989_s14  ;;  %v1670_v55 = vsel %vm1657_vm2, %v1637_v47, %v5343_v33  ;;  %v5350_v47 = vld [vmem:[#allocation21_spill] sm:$0xff] }
 0x295   : > { %1283 = vrot.lane.b32.xlu0 %v2697_v30, %s2989_s14  ;;  %v1703_v57 = vsel %vm1690_vm3, %v1670_v55, %v5344_v58  ;;  %v2900_v30 = vld [vmem:[%s3080_s7 + $0x48] sm:$0xff]  ;;  %v5352_v55 = vld [vmem:[#allocation87_spill] sm:$0xff] }
 0x296   : > { %v4531_v63 = vpop.permute.xlu2 %1277  ;;  %v1506_v14 = vpop.permute.xlu1 %1505  ;;  %v1736_v54 = vsel %vm1723_vm4, %v1703_v57, %v4064_v29  ;;  %v1598_v38 = vsel %vm1591_vm0, %v2900_v30, %v5345_v41  ;;  %v2705_v29 = vld [vmem:[%s3080_s7 + $0x198] sm:$0xff]  ;;  %v5353_v57 = vld [vmem:[#allocation99_spill] sm:$0xff] }
 0x297   : > { %v1288_v6 = vpop.permute.xlu0 %1287  ;;  %v1828_v27 = vsel %vm1822_vm8, %v1795_v36, %v1506_v14  ;;  %v1769_v12 = vsel %vm1756_vm6, %v1736_v54, %v4507_v4  ;;  %v5346_v36 = vld [vmem:[#allocation45_spill] sm:$0xff]  ;;  %v2737_v4 = vld [vmem:[%s3080_s7 + $0x199] sm:$0xff] }
 0x298   : > { %2777 = vmatmul.msk.f32.gmra.mxu0 %vm1860_vm9, %v1828_v27  ;;  %v1781_v46 = vsel %vm1756_vm6, %v4151_v5, %v1288_v6  ;;  %v2730_v5 = vld [vmem:[%s3080_s7 + $0x141] sm:$0xff]  ;;  %v1631_v14 = vsel %vm1624_vm1, %v1598_v38, %v5346_v36 }
 0x299   : > { %v5347_v6 = vld [vmem:[#allocation88_spill] sm:$0xff] }
 0x29a   : > { %v1664_v27 = vsel %vm1657_vm2, %v1631_v14, %v5347_v6 }
 0x29c   : > { %1539 = vrot.lane.b32.xlu2 %v2761_v34, %s2990_s21  ;;  %1423 = vrot.lane.b32.xlu1 %v2898_v3, %s2988_s13  ;;  %v5348_v34 = vld [vmem:[#allocation98_spill] sm:$0xff] }
 0x29d   : > { %1411 = vrot.lane.b32.xlu0 %v2729_v2, %s2988_s13  ;;  %v1697_v2 = vsel %vm1690_vm3, %v1664_v27, %v5348_v34 }
 0x29e   : > { %v1520_v20 = vpop.permute.xlu2 %1519  ;;  %v1416_v60 = vpop.permute.xlu1 %1415  ;;  %v1730_v3 = vsel %vm1723_vm4, %v1697_v2, %v4002_v26  ;;  %v2738_v26 = vld [vmem:[%s3080_s7 + $0x1a1] sm:$0xff] }
 0x29f   : > { %v1404_v28 = vpop.permute.xlu0 %1403 }
 0x2a0   : > { %v1808_v23 = vsel %vm1789_vm7, %v1775_v56, %v1404_v28 }
 0x2a1   : > { %v1841_v61 = vsel %vm1822_vm8, %v1808_v23, %v1532_v11  ;;  %v1814_v11 = vsel %vm1789_vm7, %v1781_v46, %v1416_v60  ;;  %v5349_v60 = vld [vmem:[#allocation60_spill] sm:$0xff]  ;;  %v1776_v46 = vsel %vm1756_vm6, %v4208_v22, %v4531_v63  ;;  %v2901_v63 = vld [vmem:[%s3080_s7 + $0x98] sm:$0xff] }
 0x2a2   : > { %2790 = vmatmul.msk.f32.gmra.mxu2 %vm1860_vm9, %v1841_v61 }
 0x2a4   : > { %1297 = vrot.lane.b32.xlu2 %v2704_v17, %s2989_s14  ;;  %1285 = vrot.lane.b32.xlu1 %v2698_v10, %s2989_s14  ;;  %v2706_v17 = vld [vmem:[%s3080_s7 + $0x1a0] sm:$0xff] }
 0x2a5   : > { %1551 = vrot.lane.b32.xlu0 %v5340_v25, %s2990_s21  ;;  %v2769_v25 = vld [vmem:[%s3080_s7 + $0x19a] sm:$0xff] }
 0x2a6   : > { %v1534_v52 = vpop.permute.xlu2 %1533  ;;  %v1252_v53 = vpop.permute.xlu1 %1251 }
 0x2a7   : > { %v1544_v15 = vpop.permute.xlu0 %1543 }
 0x2a8   : > { %v1847_v16 = vsel %vm1822_vm8, %v1814_v11, %v1544_v15 }
 0x2a9   : > { %2796 = vmatmul.msk.f32.vlgmr.msra.gmra.mxu3 %vm1860_vm9, %v1847_v16 }
 0x2ac   : > { %1425 = vrot.lane.b32.xlu1 %v2736_v39, %s2988_s13  ;;  %1541 = vrot.lane.b32.xlu2 %v2762_v49, %s2990_s21 }
 0x2ad   : > { %1413 = vrot.lane.b32.xlu0 %v2730_v5, %s2988_s13  ;;  %v5351_v5 = vld [vmem:[#allocation81_spill] sm:$0xff] }
 0x2ae   : > { %v1392_v8 = vpop.permute.xlu1 %1391  ;;  %v1266_v18 = vpop.permute.xlu2 %1265 }
 0x2af   : > { %v1802_v48 = vsel %vm1789_vm7, %v1769_v12, %v1392_v8  ;;  %v1380_v40 = vpop.permute.xlu0 %1379 }
 0x2b0   : > { %v1835_v0 = vsel %vm1822_vm8, %v1802_v48, %v1520_v20  ;;  %v1763_v20 = vsel %vm1756_vm6, %v1730_v3, %v1252_v53  ;;  %v5354_v3 = vld [vmem:[#allocation11_spill] sm:$0xff] }
 0x2b1   : > { %2784 = vmatmul.msk.f32.gmra.mxu1 %vm1860_vm9, %v1835_v0  ;;  %v1796_v56 = vsel %vm1789_vm7, %v1763_v20, %v1380_v40 }
 0x2b4   : > { %1299 = vrot.lane.b32.xlu1 %v2705_v29, %s2989_s14  ;;  %1427 = vrot.lane.b32.xlu2 %v2737_v4, %s2988_s13 }
 0x2b5   : > { %1553 = vrot.lane.b32.xlu0 %v5349_v60, %s2990_s21  ;;  %v5355_v60 = vld [vmem:[#allocation80_spill] sm:$0xff] }
 0x2b6   : > { %v1508_v28 = vpop.permute.xlu1 %1507  ;;  %v1280_v10 = vpop.permute.xlu2 %1279 }
 0x2b7   : > { %v1290_v23 = vpop.permute.xlu0 %1289  ;;  %v1829_v61 = vsel %vm1822_vm8, %v1796_v56, %v1508_v28  ;;  %v5356_v28 = vld [vmem:[#allocation92_spill] sm:$0xff] }
 0x2b8   : > { %2778 = vmatmul.msk.f32.gmra.mxu0 %vm1860_vm9, %v1829_v61  ;;  %v1782_v35 = vsel %vm1756_vm6, %v4272_v59, %v1290_v23 }
 0x2bc   : > { %1301 = vrot.lane.b32.xlu1 %v2706_v17, %s2989_s14  ;;  %1429 = vrot.lane.b32.xlu2 %v2738_v26, %s2988_s13  ;;  %s270_s13 = scalar_lea.vmem %s5124_s2, %s3074_s29  ;;  %s253_s29 = sand.u32 1, %s2965_s16  }
 0x2bd   : > { %1555 = vrot.lane.b32.xlu0 %v2769_v25, %s2990_s21  ;;  %s2577_s24 = sshll.u32 %s253_s29, 3  ;;  %s2444_s11 = scalar_lea.sflag [#allocation3], %s253_s29 }
 0x2be   : > { %v1418_v53 = vpop.permute.xlu1 %1417  ;;  %v1522_v7 = vpop.permute.xlu2 %1521  ;;  %s255_s8 = scalar_lea.vmem [#allocation2], %s2577_s24  ;;  %s2923_s14 = scalar_lea.hbm %s5126_s4, 16 }
 0x2bf   : > { %v1406_v11 = vpop.permute.xlu0 %1405  ;;  %v1815_v39 = vsel %vm1789_vm7, %v1782_v35, %v1418_v53  ;;  %s2459_s9 = sshll.u32 %s255_s8, 4  ;;  %s2460_s9 = int_to_ptr.vmem [resolvable:$true] %s2459_s9 }
 0x2c0   : > { %v1809_v15 = vsel %vm1789_vm7, %v1776_v46, %v1406_v11 }
 0x2c1   : > { %v1842_v16 = vsel %vm1822_vm8, %v1809_v15, %v1534_v52  ;;  %v1605_v52 = vsel %vm1591_vm0, %v2901_v63, %v5350_v47 }
 0x2c2   : > { %2791 = vmatmul.msk.f32.gmra.mxu2 %vm1860_vm9, %v1842_v16  ;;  %v1638_v33 = vsel %vm1624_vm1, %v1605_v52, %v5351_v5 }
 0x2c3   : > { %v1671_v58 = vsel %vm1657_vm2, %v1638_v33, %v5352_v55 }
 0x2c4   : > { %v1704_v59 = vsel %vm1690_vm3, %v1671_v58, %v5353_v57 }
 0x2c5   : > { %1557 = vrot.lane.b32.xlu0 %v2770_v9, %s2990_s21  ;;  %v1737_v54 = vsel %vm1723_vm4, %v1704_v59, %v4153_v45 }
 0x2c6   : > { %v1254_v49 = vpop.permute.xlu1 %1253  ;;  %v1536_v12 = vpop.permute.xlu2 %1535  ;;  %v1770_v8 = vsel %vm1756_vm6, %v1737_v54, %v1266_v18  ;;  %v1777_v18 = vsel %vm1756_vm6, %v4201_v13, %v1280_v10  ;;  %v5357_v13 = vld [vmem:[#allocation96_spill] sm:$0xff] }
 0x2c7   : > { %v1546_v50 = vpop.permute.xlu0 %1545  ;;  %v1764_v38 = vsel %vm1756_vm6, %v4107_v19, %v1254_v49  ;;  %v2902_v19 = vld [vmem:[%s3080_s7 + $0xa8] sm:$0xff]  ;;  %s2917_s7 = sshra.s32 %s2462_s10, 4  ;;  %s2918_s7 = int_to_ptr.hbm [resolvable:$true] %s2917_s7 }
 0x2c8   : > { %v1848_v22 = vsel %vm1822_vm8, %v1815_v39, %v1546_v50  ;;  %v1606_v20 = vsel %vm1591_vm0, %v2902_v19, %v5354_v3  ;;  %v4700_v3 = vpop.f32.mrf.mxu0  ;;  %s2919_s18 = scalar_lea.hbm %s2918_s7, 8  ;;  %p2924_p1 = scmp.lt.s32.totalorder %s2918_s7, %s5126_s4 }
 0x2c9   : > { %2797 = vmatmul.msk.f32.gmra.mxu3 %vm1860_vm9, %v1848_v22  ;;  %v1639_v56 = vsel %vm1624_vm1, %v1606_v20, %v5355_v60  ;;  %p2920_p12 = scmp.ne.s32.totalorder %s2918_s7, %s2919_s18  ;;  %p2925_p2 = scmp.lt.s32.totalorder %s2923_s14, %s2919_s18 }
 0x2ca   : > { %v1672_v23 = vsel %vm1657_vm2, %v1639_v56, %v5356_v28 }
 0x2cb   : > { %v1705_v61 = vsel %vm1690_vm3, %v1672_v23, %v5357_v13  ;;  %p2921_p13 = pnand %p2920_p12, %p3057_p4  ;;  %p2926_p3 = por %p2925_p2, %p2924_p1 }
 0x2cc   : > { %v1738_v26 = vsel %vm1723_vm4, %v1705_v61, %v4147_v42 }
 0x2cd   : > { %p2922_p0 = pneg %p2921_p13 }
 0x2ce   : > { %v1394_v48 = vpop.permute.xlu1 %1393  ;;  %v1396_v45 = vpop.permute.xlu2 %1395 }
 0x2cf   : > { %v1382_v40 = vpop.permute.xlu0 %1381  ;;  %v1803_v30 = vsel %vm1789_vm7, %v1770_v8, %v1394_v48  ;;  %p2927_p5 = pnand %p2926_p3, %p2922_p0 }
 0x2d0   : > { %v1836_v41 = vsel %vm1822_vm8, %v1803_v30, %v1522_v7  ;;  %v1797_v0 = vsel %vm1789_vm7, %v1764_v38, %v1382_v40  ;;  %v4709_v61 = vpop.f32.mrf.mxu0 }
 0x2d1   : > { %2785 = vmatmul.msk.f32.gmra.mxu1 %vm1860_vm9, %v1836_v41 }
 0x2d6   : > { %v1510_v36 = vpop.permute.xlu1 %1509  ;;  %v1524_v2 = vpop.permute.xlu2 %1523 }
 0x2d7   : > { %v1292_v14 = vpop.permute.xlu0 %1291  ;;  %v1830_v29 = vsel %vm1822_vm8, %v1797_v0, %v1510_v36 }
 0x2d8   : > { %2779 = vmatmul.msk.f32.gmra.mxu0 %vm1860_vm9, %v1830_v29  ;;  %v1783_v17 = vsel %vm1756_vm6, %v4268_v24, %v1292_v14 }
 0x2de   : > { %v1420_v4 = vpop.permute.xlu1 %1419  ;;  %v1538_v24 = vpop.permute.xlu2 %1537 }
 0x2df   : > { %v1408_v6 = vpop.permute.xlu0 %1407  ;;  %v1816_v10 = vsel %vm1789_vm7, %v1783_v17, %v1420_v4 }
 0x2e0   : > { %v1810_v27 = vsel %vm1789_vm7, %v1777_v18, %v1408_v6 }
 0x2e1   : > { %v1843_v34 = vsel %vm1822_vm8, %v1810_v27, %v1536_v12 }
 0x2e2   : > { %2792 = vmatmul.msk.f32.gmra.mxu2 %vm1860_vm9, %v1843_v34 }
 0x2e6   : > { %v1268_v25 = vpop.permute.xlu1 %1267  ;;  %v1398_v42 = vpop.permute.xlu2 %1397 }
 0x2e7   : > { %v1548_v46 = vpop.permute.xlu0 %1547  ;;  %v1771_v53 = vsel %vm1756_vm6, %v1738_v26, %v1268_v25 }
 0x2e8   : > { %v1849_v11 = vsel %vm1822_vm8, %v1816_v10, %v1548_v46  ;;  %v1804_v15 = vsel %vm1789_vm7, %v1771_v53, %v1396_v45  ;;  %v4718_v46 = vpop.f32.mrf.mxu1 }
 0x2e9   : > { %2798 = vmatmul.msk.f32.gmra.mxu3 %vm1860_vm9, %v1849_v11  ;;  %v1837_v16 = vsel %vm1822_vm8, %v1804_v15, %v1524_v2 }
 0x2ea   : > { %2786 = vmatmul.msk.f32.gmra.mxu1 %vm1860_vm9, %v1837_v16  ;;  %v2152_v16 = vmul.f32 %v4709_v61, %v4709_v61 }
 0x2ee   : > { %v1294_v9 = vpop.permute.xlu1 %1293  ;;  %v1526_v55 = vpop.permute.xlu2 %1525 }
 0x2ef   : > { %v1282_v7 = vpop.permute.xlu0 %1281  ;;  %v1784_v63 = vsel %vm1756_vm6, %v4172_v32, %v1294_v9  ;;  %v2151_v9 = vmul.f32 %v4700_v3, %v4700_v3 }
 0x2f0   : > { %v1778_v35 = vsel %vm1756_vm6, %v4136_v31, %v1282_v7  ;;  %v4722_v11 = vpop.f32.mrf.mxu1  ;;  %v2075_v7 = vsel %vm1591_vm0, %v4709_v61, 0.0 }
 0x2f6   : > { %v1422_v39 = vpop.permute.xlu1 %1421  ;;  %v1540_v54 = vpop.permute.xlu2 %1539 }
 0x2f7   : > { %v1410_v49 = vpop.permute.xlu0 %1409  ;;  %v1817_v47 = vsel %vm1789_vm7, %v1784_v63, %v1422_v39  ;;  %v2184_v39 = vsel %vm1591_vm0, %v2152_v16, 0.0 }
 0x2f8   : > { %v1811_v50 = vsel %vm1789_vm7, %v1778_v35, %v1410_v49  ;;  %v2074_v35 = vsel %vm1591_vm0, %v4700_v3, 0.0 }
 0x2f9   : > { %v1844_v22 = vsel %vm1822_vm8, %v1811_v50, %v1538_v24 }
 0x2fa   : > { %2793 = vmatmul.msk.f32.gmra.mxu2 %vm1860_vm9, %v1844_v22  ;;  %v2076_v22 = vadd.f32 %v2075_v7, %v2074_v35 }
 0x2fd   : > { %v4726_v15 = vpop.f32.mrf.mxu1 }
 0x2fe   : > { %v1270_v52 = vpop.permute.xlu1 %1269  ;;  %v1298_v30 = vpop.permute.xlu2 %1297 }
 0x2ff   : > { %v1550_v5 = vpop.permute.xlu0 %1549  ;;  %v1772_v33 = vsel %vm1756_vm6, %v4081_v1, %v1270_v52 }
 0x300   : > { %v1850_v31 = vsel %vm1822_vm8, %v1817_v47, %v1550_v5  ;;  %v1805_v58 = vsel %vm1789_vm7, %v1772_v33, %v1398_v42  ;;  %v2183_v47 = vsel %vm1591_vm0, %v2151_v9, 0.0  ;;  %v2093_v9 = vsel %vm1591_vm0, %v4726_v15, 0.0 }
 0x301   : > { %2799 = vmatmul.msk.f32.gmra.mxu3 %vm1860_vm9, %v1850_v31  ;;  %v1838_v57 = vsel %vm1822_vm8, %v1805_v58, %v1526_v55  ;;  %v2185_v31 = vadd.f32 %v2184_v39, %v2183_v47 }
 0x302   : > { %2787 = vmatmul.msk.f32.gmra.mxu1 %vm1860_vm9, %v1838_v57 }
 0x306   : > { %v1296_v59 = vpop.permute.xlu1 %1295 }
 0x307   : > { %v1284_v32 = vpop.permute.xlu0 %1283  ;;  %v1785_v41 = vsel %vm1756_vm6, %v4304_v37, %v1296_v59  ;;  %v1786_v37 = vsel %vm1756_vm6, %v4301_v21, %v1298_v30 }
 0x308   : > { %v1779_v12 = vsel %vm1756_vm6, %v4248_v51, %v1284_v32  ;;  %v1542_v51 = vpop.permute.xlu2 %1541 }
 0x30e   : > { %v1424_v8 = vpop.permute.xlu1 %1423  ;;  %v4745_v63 = vpop.f32.mrf.mxu1 }
 0x30f   : > { %v1412_v48 = vpop.permute.xlu0 %1411  ;;  %v1818_v38 = vsel %vm1789_vm7, %v1785_v41, %v1424_v8  ;;  %v2162_v39 = vmul.f32 %v4745_v63, %v4745_v63 }
 0x310   : > { %v1812_v1 = vsel %vm1789_vm7, %v1779_v12, %v1412_v48 }
 0x311   : > { %v1845_v40 = vsel %vm1822_vm8, %v1812_v1, %v1540_v54 }
 0x312   : > { %2794 = vmatmul.msk.f32.gmra.mxu2 %vm1860_vm9, %v1845_v40 }
 0x316   : > { %v1286_v0 = vpop.permute.xlu1 %1285 }
 0x317   : > { %v1552_v36 = vpop.permute.xlu0 %1551  ;;  %v1780_v45 = vsel %vm1756_vm6, %v4241_v62, %v1286_v0  ;;  %v1428_v62 = vpop.permute.xlu2 %1427 }
 0x318   : > { %v1851_v14 = vsel %vm1822_vm8, %v1818_v38, %v1552_v36 }
 0x319   : > { %2800 = vmatmul.msk.f32.gmra.mxu3 %vm1860_vm9, %v1851_v14 }
 0x31e   : > { %v1426_v29 = vpop.permute.xlu1 %1425 }
 0x31f   : > { %v1414_v18 = vpop.permute.xlu0 %1413  ;;  %v1819_v27 = vsel %vm1789_vm7, %v1786_v37, %v1426_v29  ;;  %v1430_v13 = vpop.permute.xlu2 %1429 }
 0x320   : > { %v1813_v4 = vsel %vm1789_vm7, %v1780_v45, %v1414_v18  ;;  %v4775_v18 = vpop.f32.mrf.mxu2 }
 0x321   : > { %v1846_v6 = vsel %vm1822_vm8, %v1813_v4, %v1542_v51 }
 0x322   : > { %2795 = vmatmul.msk.f32.gmra.mxu2 %vm1860_vm9, %v1846_v6 }
 0x326   : > { %v1300_v34 = vpop.permute.xlu1 %1299 }
 0x327   : > { %v1554_v2 = vpop.permute.xlu0 %1553  ;;  %v1787_v20 = vsel %vm1756_vm6, %v4198_v44, %v1300_v34  ;;  %v4714_v44 = vpop.f32.mrf.mxu0 }
 0x328   : > { %v1852_v19 = vsel %vm1822_vm8, %v1819_v27, %v1554_v2  ;;  %v1820_v60 = vsel %vm1789_vm7, %v1787_v20, %v1428_v62  ;;  %v2153_v42 = vmul.f32 %v4714_v44, %v4714_v44  ;;  %v2077_v49 = vsel %vm1591_vm0, %v4714_v44, 0.0 }
 0x329   : > { %2801 = vmatmul.msk.f32.gmra.mxu3 %vm1860_vm9, %v1852_v19  ;;  %v2078_v55 = vadd.f32 %v2077_v49, %v2076_v22  ;;  %v2159_v2 = vmul.f32 %v4718_v46, %v4718_v46  ;;  %v2089_v62 = vsel %vm1591_vm0, %v4718_v46, 0.0  ;;  %v2095_v22 = vsel %vm1591_vm0, %v4745_v63, 0.0 }
 0x32a   : > { %v2186_v52 = vsel %vm1591_vm0, %v2153_v42, 0.0 }
 0x32b   : > { %v2187_v32 = vadd.f32 %v2186_v52, %v2185_v31  ;;  %v2204_v52 = vsel %vm1591_vm0, %v2162_v39, 0.0 }
 0x32e   : > { %v1302_v21 = vpop.permute.xlu1 %1301  ;;  %v4770_v51 = vpop.f32.mrf.mxu1 }
 0x32f   : > { %v1556_v56 = vpop.permute.xlu0 %1555  ;;  %v1788_v23 = vsel %vm1756_vm6, %v4319_v43, %v1302_v21  ;;  %v4716_v25 = vpop.f32.mrf.mxu0  ;;  %v2097_v31 = vsel %vm1591_vm0, %v4770_v51, 0.0 }
 0x330   : > { %v1853_v28 = vsel %vm1822_vm8, %v1820_v60, %v1556_v56  ;;  %v1821_v17 = vsel %vm1789_vm7, %v1788_v23, %v1430_v13  ;;  %v2154_v50 = vmul.f32 %v4716_v25, %v4716_v25  ;;  %v2079_v5 = vsel %vm1591_vm0, %v4716_v25, 0.0  ;;  %v4787_v21 = vpop.f32.mrf.mxu2 }
 0x331   : > { %2802 = vmatmul.msk.f32.gmra.mxu3 %vm1860_vm9, %v1853_v28  ;;  %v2080_v54 = vadd.f32 %v2079_v5, %v2078_v55  ;;  %v2198_v56 = vsel %vm1591_vm0, %v2159_v2, 0.0  ;;  %v2160_v28 = vmul.f32 %v4722_v11, %v4722_v11  ;;  %v2091_v13 = vsel %vm1591_vm0, %v4722_v11, 0.0 }
 0x332   : > { %v2188_v58 = vsel %vm1591_vm0, %v2154_v50, 0.0  ;;  %v2163_v5 = vmul.f32 %v4770_v51, %v4770_v51 }
 0x333   : > { %v2189_v40 = vadd.f32 %v2188_v58, %v2187_v32 }
 0x337   : > { %v1558_v26 = vpop.permute.xlu0 %1557  ;;  %v4720_v53 = vpop.f32.mrf.mxu0 }
 0x338   : > { %v1854_v10 = vsel %vm1822_vm8, %v1821_v17, %v1558_v26  ;;  %v2155_v33 = vmul.f32 %v4720_v53, %v4720_v53  ;;  %v2081_v57 = vsel %vm1591_vm0, %v4720_v53, 0.0  ;;  %v2200_v26 = vsel %vm1591_vm0, %v2160_v28, 0.0  ;;  %v4801_v49 = vpop.f32.mrf.mxu2 }
 0x339   : > { %2803 = vmatmul.msk.f32.gmra.mxu3 %vm1860_vm9, %v1854_v10  ;;  %v2082_v30 = vadd.f32 %v2081_v57, %v2080_v54  ;;  %v2161_v10 = vmul.f32 %v4726_v15, %v4726_v15  ;;  %v4812_v57 = vpop.f32.mrf.mxu3 }
 0x33a   : > { %v2190_v8 = vsel %vm1591_vm0, %v2155_v33, 0.0 }
 0x33b   : > { %v2191_v36 = vadd.f32 %v2190_v8, %v2189_v40  ;;  %v2202_v35 = vsel %vm1591_vm0, %v2161_v10, 0.0 }
 0x33f   : > { %v4724_v43 = vpop.f32.mrf.mxu0 }
 0x340   : > { %v2156_v59 = vmul.f32 %v4724_v43, %v4724_v43  ;;  %v2083_v48 = vsel %vm1591_vm0, %v4724_v43, 0.0 }
 0x341   : > { %v2084_v14 = vadd.f32 %v2083_v48, %v2082_v30 }
 0x342   : > { %v2192_v41 = vsel %vm1591_vm0, %v2156_v59, 0.0  ;;  %v2206_v59 = vsel %vm1591_vm0, %v2163_v5, 0.0 }
 0x343   : > { %v2193_v4 = vadd.f32 %v2192_v41, %v2191_v36 }
 0x345   : > { %v4819_v8 = vpop.f32.mrf.mxu2 }
 0x347   : > { %v4730_v24 = vpop.f32.mrf.mxu0 }
 0x348   : > { %v2157_v1 = vmul.f32 %v4730_v24, %v4730_v24  ;;  %v2085_v38 = vsel %vm1591_vm0, %v4730_v24, 0.0 }
 0x349   : > { %v2086_v6 = vadd.f32 %v2085_v38, %v2084_v14 }
 0x34a   : > { %v2194_v45 = vsel %vm1591_vm0, %v2157_v1, 0.0 }
 0x34b   : > { %v2195_v27 = vadd.f32 %v2194_v45, %v2193_v4 }
 0x34e   : > { %v4782_v20 = vpop.f32.mrf.mxu1 }
 0x34f   : > { %v2164_v32 = vmul.f32 %v4782_v20, %v4782_v20  ;;  %v2099_v1 = vsel %vm1591_vm0, %v4782_v20, 0.0 }
 0x351   : > { %v2208_v38 = vsel %vm1591_vm0, %v2164_v32, 0.0 }
 0x355   : > { %v4758_v12 = vpop.f32.mrf.mxu0 }
 0x356   : > { %v2158_v0 = vmul.f32 %v4758_v12, %v4758_v12  ;;  %v2087_v29 = vsel %vm1591_vm0, %v4758_v12, 0.0 }
 0x357   : > { %v2088_v34 = vadd.f32 %v2087_v29, %v2086_v6 }
 0x358   : > { %v2196_v37 = vsel %vm1591_vm0, %v2158_v0, 0.0 }
 0x359   : > { %v2197_v19 = vadd.f32 %v2196_v37, %v2195_v27  ;;  %v2090_v60 = vadd.f32 %v2089_v62, %v2088_v34  ;;  %v2167_v37 = vmul.f32 %v4775_v18, %v4775_v18  ;;  %v4834_v27 = vpop.f32.mrf.mxu3 }
 0x35b   : > { %v2199_v23 = vadd.f32 %v2198_v56, %v2197_v19  ;;  %v2092_v17 = vadd.f32 %v2091_v13, %v2090_v60  ;;  %v2105_v19 = vsel %vm1591_vm0, %v4775_v18, 0.0  ;;  %v2214_v60 = vsel %vm1591_vm0, %v2167_v37, 0.0 }
 0x35c   : > { %v2168_v56 = vmul.f32 %v4787_v21, %v4787_v21  ;;  %v2175_v37 = vmul.f32 %v4812_v57, %v4812_v57 }
 0x35d   : > { %v2201_v16 = vadd.f32 %v2200_v26, %v2199_v23  ;;  %v2094_v7 = vadd.f32 %v2093_v9, %v2092_v17  ;;  %v2107_v23 = vsel %vm1591_vm0, %v4787_v21, 0.0  ;;  %v2169_v26 = vmul.f32 %v4801_v49, %v4801_v49 }
 0x35e   : > { %v2216_v17 = vsel %vm1591_vm0, %v2168_v56, 0.0  ;;  %v2121_v56 = vsel %vm1591_vm0, %v4812_v57, 0.0 }
 0x35f   : > { %v2203_v50 = vadd.f32 %v2202_v35, %v2201_v16  ;;  %v2096_v47 = vadd.f32 %v2095_v22, %v2094_v7  ;;  %v2109_v7 = vsel %vm1591_vm0, %v4801_v49, 0.0  ;;  %v2218_v39 = vsel %vm1591_vm0, %v2169_v26, 0.0 }
 0x360   : > { %v2230_v26 = vsel %vm1591_vm0, %v2175_v37, 0.0 }
 0x361   : > { %v2205_v33 = vadd.f32 %v2204_v52, %v2203_v50  ;;  %v2098_v55 = vadd.f32 %v2097_v31, %v2096_v47  ;;  %v2170_v50 = vmul.f32 %v4819_v8, %v4819_v8  ;;  %v2111_v47 = vsel %vm1591_vm0, %v4819_v8, 0.0 }
 0x363   : > { %v2207_v48 = vadd.f32 %v2206_v59, %v2205_v33  ;;  %v2100_v41 = vadd.f32 %v2099_v1, %v2098_v55  ;;  %v2220_v5 = vsel %vm1591_vm0, %v2170_v50, 0.0 }
 0x365   : > { %v2209_v45 = vadd.f32 %v2208_v38, %v2207_v48  ;;  %v4836_v34 = vpop.f32.mrf.mxu2 }
 0x366   : > { %v2171_v33 = vmul.f32 %v4836_v34, %v4836_v34  ;;  %v2113_v32 = vsel %vm1591_vm0, %v4836_v34, 0.0 }
 0x367   : > { %v4796_v42 = vpop.f32.mrf.mxu1 }
 0x368   : > { %v2165_v54 = vmul.f32 %v4796_v42, %v4796_v42  ;;  %v2101_v40 = vsel %vm1591_vm0, %v4796_v42, 0.0  ;;  %v2222_v48 = vsel %vm1591_vm0, %v2171_v33, 0.0 }
 0x369   : > { %v2102_v14 = vadd.f32 %v2101_v40, %v2100_v41 }
 0x36a   : > { %v2210_v0 = vsel %vm1591_vm0, %v2165_v54, 0.0 }
 0x36b   : > { %v2211_v4 = vadd.f32 %v2210_v0, %v2209_v45 }
 0x36c   : > { %v4848_v10 = vpop.f32.mrf.mxu3 }
 0x37d   : > { %v4850_v16 = vpop.f32.mrf.mxu2 }
 0x37e   : > { %v2172_v1 = vmul.f32 %v4850_v16, %v4850_v16  ;;  %v2115_v41 = vsel %vm1591_vm0, %v4850_v16, 0.0 }
 0x37f   : > { %v4810_v58 = vpop.f32.mrf.mxu1 }
 0x380   : > { %v2166_v30 = vmul.f32 %v4810_v58, %v4810_v58  ;;  %v2103_v36 = vsel %vm1591_vm0, %v4810_v58, 0.0 }
 0x381   : > { %v2104_v6 = vadd.f32 %v2103_v36, %v2102_v14  ;;  %v2224_v36 = vsel %vm1591_vm0, %v2172_v1, 0.0  ;;  %v2991_v1 = vmov 256.0  }
 0x382   : > { %v2212_v29 = vsel %vm1591_vm0, %v2166_v30, 0.0  ;;  %2890 = vrcp.f32 %v2991_v1 }
 0x383   : > { %v2213_v2 = vadd.f32 %v2212_v29, %v2211_v4  ;;  %v2106_v62 = vadd.f32 %v2105_v19, %v2104_v6 }
 0x384   : > { %v4862_v31 = vpop.f32.mrf.mxu3 }
 0x385   : > { %v2215_v28 = vadd.f32 %v2214_v60, %v2213_v2  ;;  %v2108_v13 = vadd.f32 %v2107_v23, %v2106_v62 }
 0x387   : > { %v2217_v9 = vadd.f32 %v2216_v17, %v2215_v28  ;;  %v2110_v35 = vadd.f32 %v2109_v7, %v2108_v13  ;;  %v2176_v28 = vmul.f32 %v4834_v27, %v4834_v27  ;;  %v2177_v7 = vmul.f32 %v4848_v10, %v4848_v10 }
 0x389   : > { %v2219_v22 = vadd.f32 %v2218_v39, %v2217_v9  ;;  %v2112_v52 = vadd.f32 %v2111_v47, %v2110_v35  ;;  %v2123_v9 = vsel %vm1591_vm0, %v4834_v27, 0.0  ;;  %v2232_v50 = vsel %vm1591_vm0, %v2176_v28, 0.0 }
 0x38b   : > { %v2221_v59 = vadd.f32 %v2220_v5, %v2219_v22  ;;  %v2114_v54 = vadd.f32 %v2113_v32, %v2112_v52  ;;  %v2125_v22 = vsel %vm1591_vm0, %v4848_v10, 0.0  ;;  %v2178_v52 = vmul.f32 %v4862_v31, %v4862_v31 }
 0x38c   : > { %v2127_v32 = vsel %vm1591_vm0, %v4862_v31, 0.0 }
 0x38d   : > { %v2223_v30 = vadd.f32 %v2222_v48, %v2221_v59  ;;  %v2116_v0 = vadd.f32 %v2115_v41, %v2114_v54  ;;  %v2234_v59 = vsel %vm1591_vm0, %v2177_v7, 0.0 }
 0x38f   : > { %v2225_v4 = vadd.f32 %v2224_v36, %v2223_v30 }
 0x395   : > { %v4864_v55 = vpop.f32.mrf.mxu2 }
 0x396   : > { %v2173_v40 = vmul.f32 %v4864_v55, %v4864_v55  ;;  %v2117_v38 = vsel %vm1591_vm0, %v4864_v55, 0.0 }
 0x397   : > { %v2118_v29 = vadd.f32 %v2117_v38, %v2116_v0 }
 0x398   : > { %v2226_v14 = vsel %vm1591_vm0, %v2173_v40, 0.0  ;;  %v2236_v40 = vsel %vm1591_vm0, %v2178_v52, 0.0 }
 0x399   : > { %v2227_v62 = vadd.f32 %v2226_v14, %v2225_v4  ;;  %v2891_v4 = vpop.eup %2890 }
 0x39a   : > { %v2144_v28 = vmul.f32 256.0, %v2891_v4  ;;  %vm2148_vm10 = vweird.f32 %v2891_v4 }
 0x39c   : > { %v4879_v45 = vpop.f32.mrf.mxu3  ;;  %v2145_v7 = vsub.f32 1.0, %v2144_v28 }
 0x39d   : > { %v2179_v30 = vmul.f32 %v4879_v45, %v4879_v45  ;;  %v2129_v38 = vsel %vm1591_vm0, %v4879_v45, 0.0 }
 0x39f   : > { %v2238_v14 = vsel %vm1591_vm0, %v2179_v30, 0.0 }
 0x3a5   : > { %v4881_v6 = vpop.f32.mrf.mxu2 }
 0x3a6   : > { %v2119_v2 = vsel %vm1591_vm0, %v4881_v6, 0.0  ;;  %v2174_v19 = vmul.f32 %v4881_v6, %v4881_v6 }
 0x3a7   : > { %v2120_v60 = vadd.f32 %v2119_v2, %v2118_v29 }
 0x3a8   : > { %v2228_v23 = vsel %vm1591_vm0, %v2174_v19, 0.0 }
 0x3a9   : > { %v2122_v13 = vadd.f32 %v2121_v56, %v2120_v60  ;;  %v2229_v17 = vadd.f32 %v2228_v23, %v2227_v62 }
 0x3ab   : > { %v2124_v35 = vadd.f32 %v2123_v9, %v2122_v13  ;;  %v2231_v39 = vadd.f32 %v2230_v26, %v2229_v17 }
 0x3ac   : > { %v4902_v47 = vpop.f32.mrf.mxu3 }
 0x3ad   : > { %v2126_v5 = vadd.f32 %v2125_v22, %v2124_v35  ;;  %v2233_v33 = vadd.f32 %v2232_v50, %v2231_v39  ;;  %v2180_v29 = vmul.f32 %v4902_v47, %v4902_v47  ;;  %v2131_v2 = vsel %vm1591_vm0, %v4902_v47, 0.0 }
 0x3af   : > { %v2235_v54 = vadd.f32 %v2234_v59, %v2233_v33  ;;  %v2128_v48 = vadd.f32 %v2127_v32, %v2126_v5  ;;  %v2240_v60 = vsel %vm1591_vm0, %v2180_v29, 0.0  ;;  %v2146_v33 = vmul.f32 %v2891_v4, %v2145_v7 }
 0x3b1   : > { %v2237_v41 = vadd.f32 %v2236_v40, %v2235_v54  ;;  %v2130_v0 = vadd.f32 %v2129_v38, %v2128_v48  ;;  %v2147_v1 = vadd.f32 %v2891_v4, %v2146_v33 }
 0x3b3   : > { %v2239_v37 = vadd.f32 %v2238_v14, %v2237_v41  ;;  %v2132_v62 = vadd.f32 %v2131_v2, %v2130_v0  ;;  %v2149_v0 = vsel %vm2148_vm10, %v2891_v4, %v2147_v1 }
 0x3b4   : > { %v4914_v36 = vpop.f32.mrf.mxu3 }
 0x3b5   : > { %v2181_v19 = vmul.f32 %v4914_v36, %v4914_v36  ;;  %v2133_v56 = vsel %vm1591_vm0, %v4914_v36, 0.0  ;;  %v2241_v23 = vadd.f32 %v2240_v60, %v2239_v37 }
 0x3b6   : > { %v2134_v17 = vadd.f32 %v2133_v56, %v2132_v62 }
 0x3b7   : > { %v2242_v13 = vsel %vm1591_vm0, %v2181_v19, 0.0 }
 0x3b8   : > { %v2243_v39 = vadd.f32 %v2242_v13, %v2241_v23 }
 0x3bc   : > { %v2071_v26 = vpop.f32.mrf.mxu3 }
 0x3bd   : > { %v2135_v9 = vsel %vm1591_vm0, %v2071_v26, 0.0  ;;  %v2182_v35 = vmul.f32 %v2071_v26, %v2071_v26 }
 0x3be   : > { %v2136_v50 = vadd.f32 %v2135_v9, %v2134_v17  ;;  %v2256_v9 = vld [vmem:[%s270_s13] sm:$0x1] }
 0x3bf   : > { %v2244_v22 = vsel %vm1591_vm0, %v2182_v35, 0.0  ;;  %v2269_v35 = vadd.f32 1.0, %v2256_v9 }
 0x3c0   : > { %v2137_v52 = vrot.slane %v2136_v50, 4  ;;  %v2245_v5 = vadd.f32 %v2244_v22, %v2243_v39 }
 0x3c2   : > { %v2138_v59 = vadd.f32 %v2137_v52, %v2136_v50  ;;  %v2246_v32 = vrot.slane %v2245_v5, 4  ;;  %v2257_v52 = vld [vmem:[%s276_s22] sm:$0x1] }
 0x3c4   : > { %v2139_v54 = vrot.slane %v2138_v59, 2  ;;  %v2247_v48 = vadd.f32 %v2246_v32, %v2245_v5 }
 0x3c6   : > { %v2140_v40 = vadd.f32 %v2139_v54, %v2138_v59  ;;  %v2248_v30 = vrot.slane %v2247_v48, 2 }
 0x3c8   : > { %v2141_v41 = vrot.slane %v2140_v40, 1  ;;  %v2249_v38 = vadd.f32 %v2248_v30, %v2247_v48 }
 0x3ca   : > { %v2142_v14 = vadd.f32 %v2141_v41, %v2140_v40  ;;  %v2250_v29 = vrot.slane %v2249_v38, 1 }
 0x3cc   : > { %v2150_v37 = vmul.f32 %v2149_v0, %v2142_v14  ;;  %v2251_v2 = vadd.f32 %v2250_v29, %v2249_v38 }
 0x3ce   : > { %v2252_v19 = vmul.f32 %v2251_v2, %v2149_v0  ;;  %v2253_v62 = vmul.f32 %v2150_v37, %v2150_v37 }
 0x3d0   : > { %v2254_v60 = vsub.f32 %v2252_v19, %v2253_v62 }
 0x3d2   : > { %v2255_v56 = vmax.f32 %v2254_v60, 0.0 }
 0x3d4   : > { %v2258_v28 = vadd.f32 1e-05, %v2255_v56 }
 0x3d6   : > { %2892 = vrsqrt.f32 %v2258_v28  ;;  %vm2265_vm12 = vweird.f32 %v2258_v28 }
 0x3dc   : > { %v2893_v23 = vpop.eup %2892 }
 0x3dd   : > { %v2260_v13 = vmul.f32 %v2893_v23, %v2258_v28  ;;  %vm2266_vm11 = vweird.f32 %v2893_v23 }
 0x3de   : > { %vm2267_vm13 = vmor %vm2265_vm12, %vm2266_vm11 }
 0x3df   : > { %v2261_v17 = vmul.f32 %v2893_v23, %v2260_v13 }
 0x3e1   : > { %v2262_v4 = vmul.f32 0.5, %v2261_v17 }
 0x3e3   : > { %v2263_v7 = vsub.f32 1.5, %v2262_v4 }
 0x3e5   : > { %v2264_v39 = vmul.f32 %v2893_v23, %v2263_v7 }
 0x3e7   : > { %v2268_v50 = vsel %vm2267_vm13, %v2893_v23, %v2264_v39 }
 0x3e8   : > { %v2270_v22 = vmul.f32 %v2269_v35, %v2268_v50 }
 0x3ea   : > { %v2271_v5 = vmul.f32 %v2270_v22, %v2150_v37  ;;  %v4937_v33 = vperm.slane %v2270_v22, 0 }
 0x3ec   : > { %v2272_v59 = vsub.f32 %v2257_v52, %v2271_v5  ;;  %v2305_v32 = vmul.f32 %v4937_v33, %v2071_v26  ;;  %v2290_v1 = vmul.f32 %v4937_v33, %v4775_v18  ;;  %v2274_v40 = vmul.f32 %v4937_v33, %v4700_v3 }
 0x3ed   : > { %v2289_v30 = vmul.f32 %v4937_v33, %v4810_v58  ;;  %v2304_v41 = vmul.f32 %v4937_v33, %v4914_v36  ;;  %v2291_v18 = vmul.f32 %v4937_v33, %v4787_v21  ;;  %v2275_v3 = vmul.f32 %v4937_v33, %v4709_v61 }
 0x3ee   : > { %v4940_v54 = vperm.slane %v2272_v59, 0  ;;  %v2282_v58 = vmul.f32 %v4937_v33, %v4718_v46  ;;  %v2283_v36 = vmul.f32 %v4937_v33, %v4722_v11  ;;  %v2298_v37 = vmul.f32 %v4937_v33, %v4812_v57 }
 0x3ef   : > { %v2284_v19 = vmul.f32 %v4937_v33, %v4726_v15  ;;  %v2285_v21 = vmul.f32 %v4937_v33, %v4745_v63  ;;  %v2299_v61 = vmul.f32 %v4937_v33, %v4834_v27  ;;  %v2286_v46 = vmul.f32 %v4937_v33, %v4770_v51 }
 0x3f0   : > { %v4943_v48 = vadd.f32 %v4940_v54, %v2305_v32  ;;  %v2325_v38 = vadd.f32 %v4940_v54, %v2290_v1  ;;  %v4955_v26 = vadd.f32 %v4940_v54, %v2289_v30  ;;  %v2309_v0 = vadd.f32 %v4940_v54, %v2274_v40 }
 0x3f1   : > { %v2326_v2 = vadd.f32 %v4940_v54, %v2291_v18  ;;  %v2310_v62 = vadd.f32 %v4940_v54, %v2275_v3  ;;  %v2300_v11 = vmul.f32 %v4937_v33, %v4848_v10  ;;  %v2301_v57 = vmul.f32 %v4937_v33, %v4862_v31 }
 0x3f2   : > { %v2357_v14 = vmax.f32 %v2325_v38, 0.0  ;;  %v2341_v29 = vmax.f32 %v2309_v0, 0.0  ;;  %v4983_v60 = vadd.f32 %v4940_v54, %v2298_v37  ;;  %v2302_v15 = vmul.f32 %v4937_v33, %v4879_v45 }
 0x3f3   : > { %v4988_v63 = vadd.f32 %v4940_v54, %v2282_v58  ;;  %v4991_v27 = vadd.f32 %v4940_v54, %v2299_v61  ;;  %v4994_v51 = vadd.f32 %v4940_v54, %v2283_v36  ;;  %v2358_v56 = vmax.f32 %v2326_v2, 0.0 }
 0x3f4   : > { %2405 = vxpose.xlu2.b32.start [1/16] (narrow) %v2357_v14, 8  ;;  %2373 = vxpose.xlu1.b32.start [1/16] (narrow) %v2341_v29, 8  ;;  %v4997_v10 = vadd.f32 %v4940_v54, %v2300_v11  ;;  %v5000_v31 = vadd.f32 %v4940_v54, %v2284_v19  ;;  %v5003_v28 = vadd.f32 %v4940_v54, %v2301_v57  ;;  %v2342_v13 = vmax.f32 %v2310_v62, 0.0 }
 0x3f5   : > { %v2287_v45 = vmul.f32 %v4937_v33, %v4782_v20  ;;  %v2303_v23 = vmul.f32 %v4937_v33, %v4902_v47  ;;  %v5010_v17 = vadd.f32 %v4940_v54, %v2285_v21  ;;  %v2288_v9 = vmul.f32 %v4937_v33, %v4796_v42 }
 0x3f6   : > { %v2292_v4 = vmul.f32 %v4937_v33, %v4801_v49  ;;  %v5017_v7 = vadd.f32 %v4940_v54, %v2302_v15  ;;  %v2276_v20 = vmul.f32 %v4937_v33, %v4714_v44  ;;  %v5022_v47 = vadd.f32 %v4940_v54, %v2286_v46 }
 0x3f7   : > { %v5025_v35 = vadd.f32 %v4940_v54, %v2303_v23  ;;  %v5028_v39 = vadd.f32 %v4940_v54, %v2287_v45  ;;  %v5032_v49 = vadd.f32 %v4940_v54, %v2304_v41  ;;  %v5035_v50 = vadd.f32 %v4940_v54, %v2288_v9 }
 0x3f8   : > { %v2327_v42 = vadd.f32 %v4940_v54, %v2292_v4  ;;  %v2311_v44 = vadd.f32 %v4940_v54, %v2276_v20  ;;  %v2293_v5 = vmul.f32 %v4937_v33, %v4819_v8  ;;  %v2277_v59 = vmul.f32 %v4937_v33, %v4716_v25 }
 0x3f9   : > { %v2294_v41 = vmul.f32 %v4937_v33, %v4836_v34  ;;  %v2278_v38 = vmul.f32 %v4937_v33, %v4720_v53  ;;  %v2295_v29 = vmul.f32 %v4937_v33, %v4850_v16  ;;  %v2279_v18 = vmul.f32 %v4937_v33, %v4724_v43 }
 0x3fa   : > { %v2359_v22 = vmax.f32 %v2327_v42, 0.0  ;;  %v2343_v52 = vmax.f32 %v2311_v44, 0.0  ;;  %v2328_v32 = vadd.f32 %v4940_v54, %v2293_v5  ;;  %v2312_v1 = vadd.f32 %v4940_v54, %v2277_v59 }
 0x3fb   : > { %v2329_v8 = vadd.f32 %v4940_v54, %v2294_v41  ;;  %v2313_v0 = vadd.f32 %v4940_v54, %v2278_v38  ;;  %v2330_v34 = vadd.f32 %v4940_v54, %v2295_v29  ;;  %v2314_v3 = vadd.f32 %v4940_v54, %v2279_v18 }
 0x3fc   : > { %2406 = vxpose.xlu2.b32.cont [2/16] (narrow) %v2358_v56, 8  ;;  %2374 = vxpose.xlu1.b32.cont [2/16] (narrow) %v2342_v13, 8  ;;  %v2360_v40 = vmax.f32 %v2328_v32, 0.0  ;;  %v2344_v30 = vmax.f32 %v2312_v1, 0.0  ;;  %v2296_v36 = vmul.f32 %v4937_v33, %v4864_v55  ;;  %v2280_v37 = vmul.f32 %v4937_v33, %v4730_v24 }
 0x3fd   : > { %v2361_v25 = vmax.f32 %v2329_v8, 0.0  ;;  %v2345_v14 = vmax.f32 %v2313_v0, 0.0  ;;  %v2362_v53 = vmax.f32 %v2330_v34, 0.0  ;;  %v2346_v58 = vmax.f32 %v2314_v3, 0.0 }
 0x3fe   : > { %v2331_v16 = vadd.f32 %v4940_v54, %v2296_v36  ;;  %v2315_v2 = vadd.f32 %v4940_v54, %v2280_v37  ;;  %v2297_v21 = vmul.f32 %v4937_v33, %v4881_v6  ;;  %v2281_v61 = vmul.f32 %v4937_v33, %v4758_v12 }
 0x3ff   : > { %v2365_v11 = vmax.f32 %v4983_v60, 0.0  ;;  %v2349_v57 = vmax.f32 %v4988_v63, 0.0  ;;  %v2366_v6 = vmax.f32 %v4991_v27, 0.0  ;;  %v2350_v15 = vmax.f32 %v4994_v51, 0.0 }
 0x400   : > { %v2363_v43 = vmax.f32 %v2331_v16, 0.0  ;;  %v2347_v19 = vmax.f32 %v2315_v2, 0.0  ;;  %v2332_v55 = vadd.f32 %v4940_v54, %v2297_v21  ;;  %v2316_v62 = vadd.f32 %v4940_v54, %v2281_v61 }
 0x401   : > { %v2367_v12 = vmax.f32 %v4997_v10, 0.0  ;;  %v2351_v33 = vmax.f32 %v5000_v31, 0.0  ;;  %v2368_v54 = vmax.f32 %v5003_v28, 0.0  ;;  %v2352_v60 = vmax.f32 %v5010_v17, 0.0 }
 0x402   : > { %v2364_v24 = vmax.f32 %v2332_v55, 0.0  ;;  %v2348_v46 = vmax.f32 %v2316_v62, 0.0  ;;  %v2369_v63 = vmax.f32 %v5017_v7, 0.0  ;;  %v2353_v27 = vmax.f32 %v5022_v47, 0.0 }
 0x403   : > { %v2370_v51 = vmax.f32 %v5025_v35, 0.0  ;;  %v2354_v56 = vmax.f32 %v5028_v39, 0.0  ;;  %v2371_v10 = vmax.f32 %v5032_v49, 0.0  ;;  %v2355_v31 = vmax.f32 %v5035_v50, 0.0 }
 0x404   : > { %2407 = vxpose.xlu2.b32.cont [3/16] (narrow) %v2359_v22, 8  ;;  %2375 = vxpose.xlu1.b32.cont [3/16] (narrow) %v2343_v52, 8  ;;  %v2372_v28 = vmax.f32 %v4943_v48, 0.0  ;;  %v2356_v45 = vmax.f32 %v4955_v26, 0.0 }
 0x40c   : > { %2408 = vxpose.xlu2.b32.cont [4/16] (narrow) %v2360_v40, 8  ;;  %2376 = vxpose.xlu1.b32.cont [4/16] (narrow) %v2344_v30, 8 }
 0x414   : > { %2409 = vxpose.xlu2.b32.cont [5/16] (narrow) %v2361_v25, 8  ;;  %2377 = vxpose.xlu1.b32.cont [5/16] (narrow) %v2345_v14, 8 }
 0x41c   : > { %2410 = vxpose.xlu2.b32.cont [6/16] (narrow) %v2362_v53, 8  ;;  %2378 = vxpose.xlu1.b32.cont [6/16] (narrow) %v2346_v58, 8 }
 0x424   : > { %2411 = vxpose.xlu2.b32.cont [7/16] (narrow) %v2363_v43, 8  ;;  %2379 = vxpose.xlu1.b32.cont [7/16] (narrow) %v2347_v19, 8 }
 0x42c   : > { %2412 = vxpose.xlu2.b32.cont [8/16] (narrow) %v2364_v24, 8  ;;  %2380 = vxpose.xlu1.b32.cont [8/16] (narrow) %v2348_v46, 8 }
 0x434   : > { %2413 = vxpose.xlu2.b32.cont [9/16] (narrow) %v2365_v11, 8  ;;  %2381 = vxpose.xlu1.b32.cont [9/16] (narrow) %v2349_v57, 8 }
 0x43c   : > { %2414 = vxpose.xlu2.b32.cont [10/16] (narrow) %v2366_v6, 8  ;;  %2382 = vxpose.xlu1.b32.cont [10/16] (narrow) %v2350_v15, 8 }
 0x444   : > { %2415 = vxpose.xlu2.b32.cont [11/16] (narrow) %v2367_v12, 8  ;;  %2383 = vxpose.xlu1.b32.cont [11/16] (narrow) %v2351_v33, 8 }
 0x44c   : > { %2416 = vxpose.xlu2.b32.cont [12/16] (narrow) %v2368_v54, 8  ;;  %2384 = vxpose.xlu1.b32.cont [12/16] (narrow) %v2352_v60, 8 }
 0x454   : > { %2417 = vxpose.xlu2.b32.cont [13/16] (narrow) %v2369_v63, 8  ;;  %2385 = vxpose.xlu1.b32.cont [13/16] (narrow) %v2353_v27, 8 }
 0x45c   : > { %2418 = vxpose.xlu2.b32.cont [14/16] (narrow) %v2370_v51, 8  ;;  %2386 = vxpose.xlu1.b32.cont [14/16] (narrow) %v2354_v56, 8 }
 0x464   : > { %2419 = vxpose.xlu2.b32.cont [15/16] (narrow) %v2371_v10, 8  ;;  %2387 = vxpose.xlu1.b32.cont [15/16] (narrow) %v2355_v31, 8 }
 0x46c   : > { %2420 = vxpose.xlu2.b32.end [16/16] (narrow) %v2372_v28, 8  ;;  %2388 = vxpose.xlu1.b32.end [16/16] (narrow) %v2356_v45, 8 }
 0x48d   : > { %v2421_v23 = vpop.trf.xlu2 }
 0x48e   : > { %v2439_v13 = vrot.slane %v2421_v23, 4 }
 0x498   : > { %v2389_v17 = vpop.trf.xlu1 }
 0x499   : > { %v2440_v48 = vsel %vm1957_vm5, %v2389_v17, %v2439_v13 }
 0x49a   : > { %2442 = vst [vmem:[%s255_s8] sm:$0xff] %v2440_v48 }
 0x49b   : > { %2930 = shalt.err (!%p2927_p5)
}
 0x49c   : > { %2826 = dma.vmem_to_hbm [thread:$0]  (%p3057_p4), %s2460_s9, 128, %s2462_s10, %s2444_s11  }
 0x49d PF: > { %p2832_p6 = scmp.ge.s32.totalorder %s2981_s20, 2  ;;  %s2473_s29 = sand.u32 1, %s2961_s15  }
 0x49e   : > { %s2474_s24 = scalar_lea.sflag [#allocation3], %s2473_s29 }
 0x49f   : > { %p2829_p7 = pnand %p2832_p6, %p3064_p8 }
 0x4a1   : > { %p2830_p9 = pneg %p2829_p7 }
 0x4a3   : > { %2956 = dma.done.wait (%p2830_p9), %s2474_s24, 128  }
 0x4a4   : > { %2958 = vsyncadd (%p2830_p9), %s2474_s24, 4294967168  ;;  %s17_s20 = sadd.s32 1, %s2981_s20   ;;  %s5358_s15 = smov %s2965_s16 }
 0x4a5   : > { %p14_p10 = scmp.ge.s32.totalorder %s17_s20, 4   ;;  %s5359_s16 = smov %s2969_s17 }
 0x4a6   : > { %s5360_s17 = smov %s3070_s28  ;;  %s5361_s18 = smov %s2977_s19 }
 0x4a7   : > { %s5362_s19 = smov %s5364_s23  ;;  %16 = sbr.rel (!%p14_p10) target bundleno = 4 (0x4), region = 82 }
 0x4ac   :  { %2480 = vsyncpa [#allocation3], 1 }
 0x4ad   :  { %2482 = vsyncpa [#allocation3 + $0x1], 1 }

</bundles_post_ra>
